<compile_context>
chip_gen: v7x
topology: tpu7x:2x2x1
jax: 0.10.0
libtpu: 0.0.40
codegen_flags: <defaults>
</compile_context>

<pallas_src>
import math

import jax
import jax.numpy as jnp
from jax.experimental import pallas as pl
from jax.experimental.pallas import tpu as pltpu

D_MODEL = 128
NHEAD = 8
HEAD_DIM = D_MODEL // NHEAD
DIM_FF = 1024
LN_EPS = 1e-5
LEAKY_SLOPE = 0.01  # nn.LeakyReLU default negative_slope


def _lin(x, w, b):
    # x: [n, in], w: [out, in] (PyTorch Linear layout), b: [1, out]
    y = jax.lax.dot_general(
        x, w, (((1,), (1,)), ((), ())), preferred_element_type=jnp.float32
    )
    return y + b


def _layernorm(x, g, b):
    mu = jnp.mean(x, axis=-1, keepdims=True)
    var = jnp.mean((x - mu) ** 2, axis=-1, keepdims=True)
    return (x - mu) * jax.lax.rsqrt(var + LN_EPS) * g + b


def attn_block_kernel(
    src1_ref, pos1_ref, src2_ref, pos2_ref,
    head_mask_ref, seg_mat_ref,
    wq_ref, bq_ref, wk_ref, bk_ref, wv_ref, bv_ref,
    out_w_ref, out_b_ref,
    ln1_w_ref, ln1_b_ref,
    w1_ref, b1_ref, w2_ref, b2_ref,
    ln2_w_ref, ln2_b_ref,
    out_ref,
):
    src1 = src1_ref[0]                      # [N, C]
    q_in = src1 + pos1_ref[0]               # query input = src1 + pos1
    src2 = src2_ref[0]                      # [M, C]
    k_in = src2 + pos2_ref[0]               # key input   = src2 + pos2

    # --- QKV projections: single [rows, 128] x [128, 128] MXU matmuls.
    # The 1/sqrt(head_dim) scale is already folded into wq/bq by the wrapper.
    q = _lin(q_in, wq_ref[...], bq_ref[...])    # [N, C]
    k = _lin(k_in, wk_ref[...], bk_ref[...])    # [M, C]
    v = _lin(src2, wv_ref[...], bv_ref[...])    # [M, C]

    # --- Lane-packed multi-head attention (block-diagonal trick).
    # head_mask[j, c] = 1 iff feature column c belongs to head (j // M).
    head_mask = head_mask_ref[...]                                        # [HM, C]
    k_bd = jnp.concatenate([k] * NHEAD, axis=0) * head_mask               # [HM, C]
    v_bd = jnp.concatenate([v] * NHEAD, axis=0) * head_mask               # [HM, C]

    # scores[n, h*M + m] = <q_h[n], k_h[m]> / sqrt(head_dim)   (single K=128 matmul)
    s = jax.lax.dot_general(
        q, k_bd, (((1,), (1,)), ((), ())), preferred_element_type=jnp.float32
    )                                                                     # [N, HM]

    # Segmented softmax over each head's M keys.  Shifting by the per-row global max is
    # constant within every head segment, so the result equals the per-head softmax
    # exactly; the maximum() only guards against full-segment exp underflow -> NaN.
    s = s - jnp.max(s, axis=-1, keepdims=True)
    e = jnp.exp(s)
    denom = jnp.dot(e, seg_mat_ref[...], preferred_element_type=jnp.float32)  # [N, HM]
    denom = jnp.maximum(denom, jnp.float32(1e-30))
    p = e * pl.reciprocal(denom, approx=False)

    # context[n, c] = sum_m p[n, head(c)*M + m] * v[m, c]  ==  concat of per-head outputs.
    attn_out = jnp.dot(p, v_bd, preferred_element_type=jnp.float32)       # [N, C]

    # --- Output projection + residual + LayerNorm1.
    attn_proj = _lin(attn_out, out_w_ref[...], out_b_ref[...])
    x = _layernorm(src1 + attn_proj, ln1_w_ref[...], ln1_b_ref[...])

    # --- FFN: linear1 -> LeakyReLU -> linear2, residual, LayerNorm2.
    h1 = _lin(x, w1_ref[...], b1_ref[...])
    h1 = jnp.where(h1 > 0, h1, LEAKY_SLOPE * h1)
    h2 = _lin(h1, w2_ref[...], b2_ref[...])
    y = _layernorm(x + h2, ln2_w_ref[...], ln2_b_ref[...])

    out_ref[0] = y


def attn_module_forward(src1, pos1, src2, pos2, params):
    """src1, pos1: [B, C, N]; src2, pos2: [B, C, M]; returns [B, C, N]."""
    B, C, N = src1.shape
    M = src2.shape[2]
    assert C == D_MODEL
    HM = NHEAD * M

    # [B, C, N] -> [B, N, C] (feature axis on the 128-lane axis)
    s1 = jnp.transpose(src1, (0, 2, 1))
    p1 = jnp.transpose(pos1, (0, 2, 1))
    s2 = jnp.transpose(src2, (0, 2, 1))
    p2 = jnp.transpose(pos2, (0, 2, 1))

    # Split packed in_proj into q/k/v and fold the 1/sqrt(head_dim) scale into Q.
    scale = 1.0 / math.sqrt(HEAD_DIM)
    in_w, in_b = params["in_w"], params["in_b"]
    wq = in_w[0:C, :] * scale
    bq = in_b[:, 0:C] * scale
    wk = in_w[C:2 * C, :]
    bk = in_b[:, C:2 * C]
    wv = in_w[2 * C:3 * C, :]
    bv = in_b[:, 2 * C:3 * C]

    # Constant masks for the lane-packed block-diagonal attention (built once, DMA'd once).
    j = jnp.arange(HM)[:, None]
    c = jnp.arange(C)[None, :]
    head_mask = ((j // M) == (c // HEAD_DIM)).astype(jnp.float32)   # [HM, C]
    a = jnp.arange(HM)
    seg_mat = ((a[:, None] // M) == (a[None, :] // M)).astype(jnp.float32)  # [HM, HM]

    const_args = [
        head_mask, seg_mat,
        wq, bq, wk, bk, wv, bv,
        params["out_w"], params["out_b"],
        params["ln1_w"], params["ln1_b"],
        params["w1"], params["b1"], params["w2"], params["b2"],
        params["ln2_w"], params["ln2_b"],
    ]

    seq_spec_n = pl.BlockSpec((1, N, C), lambda b: (b, 0, 0))
    seq_spec_m = pl.BlockSpec((1, M, C), lambda b: (b, 0, 0))

    def full2d(arr):
        return pl.BlockSpec(arr.shape, lambda b: (0, 0))

    const_specs = [full2d(a_) for a_ in const_args]

    out = pl.pallas_call(
        attn_block_kernel,
        out_shape=jax.ShapeDtypeStruct((B, N, C), jnp.float32),
        grid=(B,),
        in_specs=[seq_spec_n, seq_spec_n, seq_spec_m, seq_spec_m] + const_specs,
        out_specs=pl.BlockSpec((1, N, C), lambda b: (b, 0, 0)),
        compiler_params=pltpu.CompilerParams(
            dimension_semantics=("parallel",),
            vmem_limit_bytes=32 * 1024 * 1024,
        ),
    )(s1, p1, s2, p2, *const_args)

    # [B, N, C] -> [B, C, N]
    return jnp.transpose(out, (0, 2, 1))


def reference_forward(src1, pos1, src2, pos2, params):
    """Pure-JAX reference replicating PyTorch MultiheadAttention + block (eval mode)."""
    B, C, N = src1.shape
    M = src2.shape[2]
    s1 = jnp.transpose(src1, (0, 2, 1))
    p1 = jnp.transpose(pos1, (0, 2, 1))
    s2 = jnp.transpose(src2, (0, 2, 1))
    p2 = jnp.transpose(pos2, (0, 2, 1))

    in_w, in_b = params["in_w"], params["in_b"][0]
    q = (s1 + p1) @ in_w[0:C].T + in_b[0:C]
    k = (s2 + p2) @ in_w[C:2 * C].T + in_b[C:2 * C]
    v = s2 @ in_w[2 * C:3 * C].T + in_b[2 * C:3 * C]

    q = q.reshape(B, N, NHEAD, HEAD_DIM) * (1.0 / math.sqrt(HEAD_DIM))
    k = k.reshape(B, M, NHEAD, HEAD_DIM)
    v = v.reshape(B, M, NHEAD, HEAD_DIM)
    s = jnp.einsum("bnhd,bmhd->bhnm", q, k)
    p = jax.nn.softmax(s, axis=-1)
    o = jnp.einsum("bhnm,bmhd->bnhd", p, v).reshape(B, N, C)
    o = o @ params["out_w"].T + params["out_b"][0]

    def ln(x, g, b):
        mu = x.mean(-1, keepdims=True)
        var = ((x - mu) ** 2).mean(-1, keepdims=True)
        return (x - mu) / jnp.sqrt(var + LN_EPS) * g[0] + b[0]

    x = ln(s1 + o, params["ln1_w"], params["ln1_b"])
    h1 = x @ params["w1"].T + params["b1"][0]
    h1 = jnp.where(h1 > 0, h1, LEAKY_SLOPE * h1)
    h2 = h1 @ params["w2"].T + params["b2"][0]
    y = ln(x + h2, params["ln2_w"], params["ln2_b"])
    return jnp.transpose(y, (0, 2, 1))


def make_params(key):
    ks = jax.random.split(key, 12)
    f32 = jnp.float32
    p = {
        "in_w": jax.random.normal(ks[0], (3 * D_MODEL, D_MODEL), f32) * 0.05,
        "in_b": jax.random.normal(ks[1], (1, 3 * D_MODEL), f32) * 0.02,
        "out_w": jax.random.normal(ks[2], (D_MODEL, D_MODEL), f32) * 0.05,
        "out_b": jax.random.normal(ks[3], (1, D_MODEL), f32) * 0.02,
        "ln1_w": 1.0 + jax.random.normal(ks[4], (1, D_MODEL), f32) * 0.02,
        "ln1_b": jax.random.normal(ks[5], (1, D_MODEL), f32) * 0.02,
        "w1": jax.random.normal(ks[6], (DIM_FF, D_MODEL), f32) * 0.05,
        "b1": jax.random.normal(ks[7], (1, DIM_FF), f32) * 0.02,
        "w2": jax.random.normal(ks[8], (D_MODEL, DIM_FF), f32) * 0.05,
        "b2": jax.random.normal(ks[9], (1, D_MODEL), f32) * 0.02,
        "ln2_w": 1.0 + jax.random.normal(ks[10], (1, D_MODEL), f32) * 0.02,
        "ln2_b": jax.random.normal(ks[11], (1, D_MODEL), f32) * 0.02,
    }
    return p


if __name__ == "__main__":
    key = jax.random.PRNGKey(0)
    kp, k1, k2, k3, k4 = jax.random.split(key, 5)
    params = make_params(kp)

    B, C, N, M = 2, D_MODEL, 8, 8
    src1 = jax.random.normal(k1, (B, C, N), jnp.float32)
    pos1 = jax.random.normal(k2, (B, C, N), jnp.float32)
    src2 = jax.random.normal(k3, (B, C, M), jnp.float32)
    pos2 = jax.random.normal(k4, (B, C, M), jnp.float32)

    fwd = jax.jit(attn_module_forward)
    out = jax.block_until_ready(fwd(src1, pos1, src2, pos2, params))

    ref = jax.block_until_ready(reference_forward(src1, pos1, src2, pos2, params))
    assert out.shape == (B, C, N), out.shape
    assert jnp.allclose(out, ref, atol=1e-4, rtol=1e-4), float(jnp.max(jnp.abs(out - ref)))

    print("KERNEL_OK")
</pallas_src>

<mosaic_0001>
module attributes {stable_mosaic.version = 11 : i64} {
  func.func @attn_block_kernel(%arg0: i32, %arg1: memref<1x8x128xf32, #tpu.memory_space<vmem>>, %arg2: memref<1x8x128xf32, #tpu.memory_space<vmem>>, %arg3: memref<1x8x128xf32, #tpu.memory_space<vmem>>, %arg4: memref<1x8x128xf32, #tpu.memory_space<vmem>>, %arg5: memref<64x128xf32, #tpu.memory_space<vmem>>, %arg6: memref<64x64xf32, #tpu.memory_space<vmem>>, %arg7: memref<128x128xf32, #tpu.memory_space<vmem>>, %arg8: memref<1x128xf32, #tpu.memory_space<vmem>>, %arg9: memref<128x128xf32, #tpu.memory_space<vmem>>, %arg10: memref<1x128xf32, #tpu.memory_space<vmem>>, %arg11: memref<128x128xf32, #tpu.memory_space<vmem>>, %arg12: memref<1x128xf32, #tpu.memory_space<vmem>>, %arg13: memref<128x128xf32, #tpu.memory_space<vmem>>, %arg14: memref<1x128xf32, #tpu.memory_space<vmem>>, %arg15: memref<1x128xf32, #tpu.memory_space<vmem>>, %arg16: memref<1x128xf32, #tpu.memory_space<vmem>>, %arg17: memref<1024x128xf32, #tpu.memory_space<vmem>>, %arg18: memref<1x1024xf32, #tpu.memory_space<vmem>>, %arg19: memref<128x1024xf32, #tpu.memory_space<vmem>>, %arg20: memref<1x128xf32, #tpu.memory_space<vmem>>, %arg21: memref<1x128xf32, #tpu.memory_space<vmem>>, %arg22: memref<1x128xf32, #tpu.memory_space<vmem>>, %arg23: memref<1x8x128xf32, #tpu.memory_space<vmem>>) attributes {dimension_semantics = [#tpu.dimension_semantics<parallel>], iteration_bounds = array<i64: 2>, scalar_prefetch = 0 : i64, scratch_operands = 0 : i64, tpu.core_type = #tpu.core_type<tc>, window_params = [{transform_indices = @transform_0, window_bounds = array<i64: 1, 8, 128>}, {transform_indices = @transform_1, window_bounds = array<i64: 1, 8, 128>}, {transform_indices = @transform_2, window_bounds = array<i64: 1, 8, 128>}, {transform_indices = @transform_3, window_bounds = array<i64: 1, 8, 128>}, {pipeline_mode = #tpu.pipeline_mode<synchronous>, transform_indices = @transform_4, window_bounds = array<i64: 64, 128>}, {pipeline_mode = #tpu.pipeline_mode<synchronous>, transform_indices = @transform_5, window_bounds = array<i64: 64, 64>}, {pipeline_mode = #tpu.pipeline_mode<synchronous>, transform_indices = @transform_6, window_bounds = array<i64: 128, 128>}, {pipeline_mode = #tpu.pipeline_mode<synchronous>, transform_indices = @transform_7, window_bounds = array<i64: 1, 128>}, {pipeline_mode = #tpu.pipeline_mode<synchronous>, transform_indices = @transform_8, window_bounds = array<i64: 128, 128>}, {pipeline_mode = #tpu.pipeline_mode<synchronous>, transform_indices = @transform_9, window_bounds = array<i64: 1, 128>}, {pipeline_mode = #tpu.pipeline_mode<synchronous>, transform_indices = @transform_10, window_bounds = array<i64: 128, 128>}, {pipeline_mode = #tpu.pipeline_mode<synchronous>, transform_indices = @transform_11, window_bounds = array<i64: 1, 128>}, {pipeline_mode = #tpu.pipeline_mode<synchronous>, transform_indices = @transform_12, window_bounds = array<i64: 128, 128>}, {pipeline_mode = #tpu.pipeline_mode<synchronous>, transform_indices = @transform_13, window_bounds = array<i64: 1, 128>}, {pipeline_mode = #tpu.pipeline_mode<synchronous>, transform_indices = @transform_14, window_bounds = array<i64: 1, 128>}, {pipeline_mode = #tpu.pipeline_mode<synchronous>, transform_indices = @transform_15, window_bounds = array<i64: 1, 128>}, {pipeline_mode = #tpu.pipeline_mode<synchronous>, transform_indices = @transform_16, window_bounds = array<i64: 1024, 128>}, {pipeline_mode = #tpu.pipeline_mode<synchronous>, transform_indices = @transform_17, window_bounds = array<i64: 1, 1024>}, {pipeline_mode = #tpu.pipeline_mode<synchronous>, transform_indices = @transform_18, window_bounds = array<i64: 128, 1024>}, {pipeline_mode = #tpu.pipeline_mode<synchronous>, transform_indices = @transform_19, window_bounds = array<i64: 1, 128>}, {pipeline_mode = #tpu.pipeline_mode<synchronous>, transform_indices = @transform_20, window_bounds = array<i64: 1, 128>}, {pipeline_mode = #tpu.pipeline_mode<synchronous>, transform_indices = @transform_21, window_bounds = array<i64: 1, 128>}, {transform_indices = @transform_22, window_bounds = array<i64: 1, 8, 128>}]} {
    %c0 = arith.constant 0 : index
    %c0_0 = arith.constant 0 : index
    %c0_1 = arith.constant 0 : index
    %0 = vector.load %arg1[%c0, %c0_0, %c0_1] : memref<1x8x128xf32, #tpu.memory_space<vmem>>, vector<1x8x128xf32>
    %1 = vector.shape_cast %0 : vector<1x8x128xf32> to vector<8x128xf32>
    %c0_2 = arith.constant 0 : index
    %c0_3 = arith.constant 0 : index
    %c0_4 = arith.constant 0 : index
    %2 = vector.load %arg2[%c0_2, %c0_3, %c0_4] : memref<1x8x128xf32, #tpu.memory_space<vmem>>, vector<1x8x128xf32>
    %3 = vector.shape_cast %2 : vector<1x8x128xf32> to vector<8x128xf32>
    %4 = arith.addf %1, %3 : vector<8x128xf32>
    %c0_5 = arith.constant 0 : index
    %c0_6 = arith.constant 0 : index
    %c0_7 = arith.constant 0 : index
    %5 = vector.load %arg3[%c0_5, %c0_6, %c0_7] : memref<1x8x128xf32, #tpu.memory_space<vmem>>, vector<1x8x128xf32>
    %6 = vector.shape_cast %5 : vector<1x8x128xf32> to vector<8x128xf32>
    %c0_8 = arith.constant 0 : index
    %c0_9 = arith.constant 0 : index
    %c0_10 = arith.constant 0 : index
    %7 = vector.load %arg4[%c0_8, %c0_9, %c0_10] : memref<1x8x128xf32, #tpu.memory_space<vmem>>, vector<1x8x128xf32>
    %8 = vector.shape_cast %7 : vector<1x8x128xf32> to vector<8x128xf32>
    %9 = arith.addf %6, %8 : vector<8x128xf32>
    %c0_11 = arith.constant 0 : index
    %c0_12 = arith.constant 0 : index
    %10 = vector.load %arg7[%c0_11, %c0_12] : memref<128x128xf32, #tpu.memory_space<vmem>>, vector<128x128xf32>
    %c0_13 = arith.constant 0 : index
    %c0_14 = arith.constant 0 : index
    %11 = vector.load %arg8[%c0_13, %c0_14] : memref<1x128xf32, #tpu.memory_space<vmem>>, vector<1x128xf32>
    %cst = arith.constant dense<0.000000e+00> : vector<8x128xf32>
    %12 = tpu.matmul %4, %10, %cst {dimension_numbers = #tpu.dot_dimension_numbers<[1], [1], [0], [0], [0, 0, 1, 0], [], []>} : vector<8x128xf32>, vector<128x128xf32>, vector<8x128xf32> -> vector<8x128xf32>
    %13 = vector.broadcast %11 : vector<1x128xf32> to vector<8x128xf32>
    %14 = arith.addf %12, %13 : vector<8x128xf32>
    %c0_15 = arith.constant 0 : index
    %c0_16 = arith.constant 0 : index
    %15 = vector.load %arg9[%c0_15, %c0_16] : memref<128x128xf32, #tpu.memory_space<vmem>>, vector<128x128xf32>
    %c0_17 = arith.constant 0 : index
    %c0_18 = arith.constant 0 : index
    %16 = vector.load %arg10[%c0_17, %c0_18] : memref<1x128xf32, #tpu.memory_space<vmem>>, vector<1x128xf32>
    %cst_19 = arith.constant dense<0.000000e+00> : vector<8x128xf32>
    %17 = tpu.matmul %9, %15, %cst_19 {dimension_numbers = #tpu.dot_dimension_numbers<[1], [1], [0], [0], [0, 0, 1, 0], [], []>} : vector<8x128xf32>, vector<128x128xf32>, vector<8x128xf32> -> vector<8x128xf32>
    %18 = vector.broadcast %16 : vector<1x128xf32> to vector<8x128xf32>
    %19 = arith.addf %17, %18 : vector<8x128xf32>
    %c0_20 = arith.constant 0 : index
    %c0_21 = arith.constant 0 : index
    %20 = vector.load %arg11[%c0_20, %c0_21] : memref<128x128xf32, #tpu.memory_space<vmem>>, vector<128x128xf32>
    %c0_22 = arith.constant 0 : index
    %c0_23 = arith.constant 0 : index
    %21 = vector.load %arg12[%c0_22, %c0_23] : memref<1x128xf32, #tpu.memory_space<vmem>>, vector<1x128xf32>
    %cst_24 = arith.constant dense<0.000000e+00> : vector<8x128xf32>
    %22 = tpu.matmul %6, %20, %cst_24 {dimension_numbers = #tpu.dot_dimension_numbers<[1], [1], [0], [0], [0, 0, 1, 0], [], []>} : vector<8x128xf32>, vector<128x128xf32>, vector<8x128xf32> -> vector<8x128xf32>
    %23 = vector.broadcast %21 : vector<1x128xf32> to vector<8x128xf32>
    %24 = arith.addf %22, %23 : vector<8x128xf32>
    %c0_25 = arith.constant 0 : index
    %c0_26 = arith.constant 0 : index
    %25 = vector.load %arg5[%c0_25, %c0_26] : memref<64x128xf32, #tpu.memory_space<vmem>>, vector<64x128xf32>
    %26 = tpu.concatenate %19, %19, %19, %19, %19, %19, %19, %19 in 0 : vector<8x128xf32>, vector<8x128xf32>, vector<8x128xf32>, vector<8x128xf32>, vector<8x128xf32>, vector<8x128xf32>, vector<8x128xf32>, vector<8x128xf32> -> vector<64x128xf32>
    %27 = arith.mulf %26, %25 : vector<64x128xf32>
    %28 = tpu.concatenate %24, %24, %24, %24, %24, %24, %24, %24 in 0 : vector<8x128xf32>, vector<8x128xf32>, vector<8x128xf32>, vector<8x128xf32>, vector<8x128xf32>, vector<8x128xf32>, vector<8x128xf32>, vector<8x128xf32> -> vector<64x128xf32>
    %29 = arith.mulf %28, %25 : vector<64x128xf32>
    %cst_27 = arith.constant dense<0.000000e+00> : vector<8x64xf32>
    %30 = tpu.matmul %14, %27, %cst_27 {dimension_numbers = #tpu.dot_dimension_numbers<[1], [1], [0], [0], [0, 0, 1, 0], [], []>} : vector<8x128xf32>, vector<64x128xf32>, vector<8x64xf32> -> vector<8x64xf32>
    %cst_28 = arith.constant dense<0xFF800000> : vector<8xf32>
    %31 = vector.multi_reduction <maximumf>, %30, %cst_28 [1] : vector<8x64xf32> to vector<8xf32>
    %32 = vector.shape_cast %31 : vector<8xf32> to vector<8x1xf32>
    %33 = vector.broadcast %32 : vector<8x1xf32> to vector<8x64xf32>
    %34 = arith.subf %30, %33 : vector<8x64xf32>
    %35 = math.exp %34 : vector<8x64xf32>
    %c0_29 = arith.constant 0 : index
    %c0_30 = arith.constant 0 : index
    %36 = vector.load %arg6[%c0_29, %c0_30] : memref<64x64xf32, #tpu.memory_space<vmem>>, vector<64x64xf32>
    %cst_31 = arith.constant dense<0.000000e+00> : vector<8x64xf32>
    %37 = tpu.matmul %35, %36, %cst_31 {dimension_numbers = #tpu.dot_dimension_numbers<[1], [0], [0], [1], [0, 0, 1, 1], [], []>} : vector<8x64xf32>, vector<64x64xf32>, vector<8x64xf32> -> vector<8x64xf32>
    %cst_32 = arith.constant 1.000000e-30 : f32
    %38 = vector.broadcast %cst_32 : f32 to vector<8x64xf32>
    %39 = arith.maximumf %37, %38 : vector<8x64xf32>
    %40 = tpu.reciprocal %39 : vector<8x64xf32> -> vector<8x64xf32>
    %41 = arith.mulf %35, %40 : vector<8x64xf32>
    %cst_33 = arith.constant dense<0.000000e+00> : vector<8x128xf32>
    %42 = tpu.matmul %41, %29, %cst_33 {dimension_numbers = #tpu.dot_dimension_numbers<[1], [0], [0], [1], [0, 0, 1, 1], [], []>} : vector<8x64xf32>, vector<64x128xf32>, vector<8x128xf32> -> vector<8x128xf32>
    %c0_34 = arith.constant 0 : index
    %c0_35 = arith.constant 0 : index
    %43 = vector.load %arg13[%c0_34, %c0_35] : memref<128x128xf32, #tpu.memory_space<vmem>>, vector<128x128xf32>
    %c0_36 = arith.constant 0 : index
    %c0_37 = arith.constant 0 : index
    %44 = vector.load %arg14[%c0_36, %c0_37] : memref<1x128xf32, #tpu.memory_space<vmem>>, vector<1x128xf32>
    %cst_38 = arith.constant dense<0.000000e+00> : vector<8x128xf32>
    %45 = tpu.matmul %42, %43, %cst_38 {dimension_numbers = #tpu.dot_dimension_numbers<[1], [1], [0], [0], [0, 0, 1, 0], [], []>} : vector<8x128xf32>, vector<128x128xf32>, vector<8x128xf32> -> vector<8x128xf32>
    %46 = vector.broadcast %44 : vector<1x128xf32> to vector<8x128xf32>
    %47 = arith.addf %45, %46 : vector<8x128xf32>
    %48 = arith.addf %1, %47 : vector<8x128xf32>
    %c0_39 = arith.constant 0 : index
    %c0_40 = arith.constant 0 : index
    %49 = vector.load %arg15[%c0_39, %c0_40] : memref<1x128xf32, #tpu.memory_space<vmem>>, vector<1x128xf32>
    %c0_41 = arith.constant 0 : index
    %c0_42 = arith.constant 0 : index
    %50 = vector.load %arg16[%c0_41, %c0_42] : memref<1x128xf32, #tpu.memory_space<vmem>>, vector<1x128xf32>
    %cst_43 = arith.constant dense<0.000000e+00> : vector<8xf32>
    %51 = vector.multi_reduction <add>, %48, %cst_43 [1] : vector<8x128xf32> to vector<8xf32>
    %52 = vector.shape_cast %51 : vector<8xf32> to vector<8x1xf32>
    %cst_44 = arith.constant 1.280000e+02 : f32
    %53 = vector.broadcast %cst_44 : f32 to vector<8x1xf32>
    %54 = arith.divf %52, %53 : vector<8x1xf32>
    %55 = vector.broadcast %54 : vector<8x1xf32> to vector<8x128xf32>
    %56 = arith.subf %48, %55 : vector<8x128xf32>
    %57 = arith.mulf %56, %56 : vector<8x128xf32>
    %cst_45 = arith.constant dense<0.000000e+00> : vector<8xf32>
    %58 = vector.multi_reduction <add>, %57, %cst_45 [1] : vector<8x128xf32> to vector<8xf32>
    %59 = vector.shape_cast %58 : vector<8xf32> to vector<8x1xf32>
    %cst_46 = arith.constant 1.280000e+02 : f32
    %60 = vector.broadcast %cst_46 : f32 to vector<8x1xf32>
    %61 = arith.divf %59, %60 : vector<8x1xf32>
    %62 = vector.broadcast %54 : vector<8x1xf32> to vector<8x128xf32>
    %63 = arith.subf %48, %62 : vector<8x128xf32>
    %cst_47 = arith.constant 9.99999974E-6 : f32
    %64 = vector.broadcast %cst_47 : f32 to vector<8x1xf32>
    %65 = arith.addf %61, %64 : vector<8x1xf32>
    %66 = math.rsqrt %65 : vector<8x1xf32>
    %67 = vector.broadcast %66 : vector<8x1xf32> to vector<8x128xf32>
    %68 = arith.mulf %63, %67 : vector<8x128xf32>
    %69 = vector.broadcast %49 : vector<1x128xf32> to vector<8x128xf32>
    %70 = arith.mulf %68, %69 : vector<8x128xf32>
    %71 = vector.broadcast %50 : vector<1x128xf32> to vector<8x128xf32>
    %72 = arith.addf %70, %71 : vector<8x128xf32>
    %c0_48 = arith.constant 0 : index
    %c0_49 = arith.constant 0 : index
    %73 = vector.load %arg17[%c0_48, %c0_49] : memref<1024x128xf32, #tpu.memory_space<vmem>>, vector<1024x128xf32>
    %c0_50 = arith.constant 0 : index
    %c0_51 = arith.constant 0 : index
    %74 = vector.load %arg18[%c0_50, %c0_51] : memref<1x1024xf32, #tpu.memory_space<vmem>>, vector<1x1024xf32>
    %cst_52 = arith.constant dense<0.000000e+00> : vector<8x1024xf32>
    %75 = tpu.matmul %72, %73, %cst_52 {dimension_numbers = #tpu.dot_dimension_numbers<[1], [1], [0], [0], [0, 0, 1, 0], [], []>} : vector<8x128xf32>, vector<1024x128xf32>, vector<8x1024xf32> -> vector<8x1024xf32>
    %76 = vector.broadcast %74 : vector<1x1024xf32> to vector<8x1024xf32>
    %77 = arith.addf %75, %76 : vector<8x1024xf32>
    %cst_53 = arith.constant 0.000000e+00 : f32
    %78 = vector.broadcast %cst_53 : f32 to vector<8x1024xf32>
    %79 = arith.cmpf ogt, %77, %78 : vector<8x1024xf32>
    %cst_54 = arith.constant 0.00999999977 : f32
    %80 = vector.broadcast %cst_54 : f32 to vector<8x1024xf32>
    %81 = arith.mulf %80, %77 : vector<8x1024xf32>
    %82 = arith.select %79, %77, %81 : vector<8x1024xi1>, vector<8x1024xf32>
    %c0_55 = arith.constant 0 : index
    %c0_56 = arith.constant 0 : index
    %83 = vector.load %arg19[%c0_55, %c0_56] : memref<128x1024xf32, #tpu.memory_space<vmem>>, vector<128x1024xf32>
    %c0_57 = arith.constant 0 : index
    %c0_58 = arith.constant 0 : index
    %84 = vector.load %arg20[%c0_57, %c0_58] : memref<1x128xf32, #tpu.memory_space<vmem>>, vector<1x128xf32>
    %cst_59 = arith.constant dense<0.000000e+00> : vector<8x128xf32>
    %85 = tpu.matmul %82, %83, %cst_59 {dimension_numbers = #tpu.dot_dimension_numbers<[1], [1], [0], [0], [0, 0, 1, 0], [], []>} : vector<8x1024xf32>, vector<128x1024xf32>, vector<8x128xf32> -> vector<8x128xf32>
    %86 = vector.broadcast %84 : vector<1x128xf32> to vector<8x128xf32>
    %87 = arith.addf %85, %86 : vector<8x128xf32>
    %88 = arith.addf %72, %87 : vector<8x128xf32>
    %c0_60 = arith.constant 0 : index
    %c0_61 = arith.constant 0 : index
    %89 = vector.load %arg21[%c0_60, %c0_61] : memref<1x128xf32, #tpu.memory_space<vmem>>, vector<1x128xf32>
    %c0_62 = arith.constant 0 : index
    %c0_63 = arith.constant 0 : index
    %90 = vector.load %arg22[%c0_62, %c0_63] : memref<1x128xf32, #tpu.memory_space<vmem>>, vector<1x128xf32>
    %cst_64 = arith.constant dense<0.000000e+00> : vector<8xf32>
    %91 = vector.multi_reduction <add>, %88, %cst_64 [1] : vector<8x128xf32> to vector<8xf32>
    %92 = vector.shape_cast %91 : vector<8xf32> to vector<8x1xf32>
    %cst_65 = arith.constant 1.280000e+02 : f32
    %93 = vector.broadcast %cst_65 : f32 to vector<8x1xf32>
    %94 = arith.divf %92, %93 : vector<8x1xf32>
    %95 = vector.broadcast %94 : vector<8x1xf32> to vector<8x128xf32>
    %96 = arith.subf %88, %95 : vector<8x128xf32>
    %97 = arith.mulf %96, %96 : vector<8x128xf32>
    %cst_66 = arith.constant dense<0.000000e+00> : vector<8xf32>
    %98 = vector.multi_reduction <add>, %97, %cst_66 [1] : vector<8x128xf32> to vector<8xf32>
    %99 = vector.shape_cast %98 : vector<8xf32> to vector<8x1xf32>
    %cst_67 = arith.constant 1.280000e+02 : f32
    %100 = vector.broadcast %cst_67 : f32 to vector<8x1xf32>
    %101 = arith.divf %99, %100 : vector<8x1xf32>
    %102 = vector.broadcast %94 : vector<8x1xf32> to vector<8x128xf32>
    %103 = arith.subf %88, %102 : vector<8x128xf32>
    %cst_68 = arith.constant 9.99999974E-6 : f32
    %104 = vector.broadcast %cst_68 : f32 to vector<8x1xf32>
    %105 = arith.addf %101, %104 : vector<8x1xf32>
    %106 = math.rsqrt %105 : vector<8x1xf32>
    %107 = vector.broadcast %106 : vector<8x1xf32> to vector<8x128xf32>
    %108 = arith.mulf %103, %107 : vector<8x128xf32>
    %109 = vector.broadcast %89 : vector<1x128xf32> to vector<8x128xf32>
    %110 = arith.mulf %108, %109 : vector<8x128xf32>
    %111 = vector.broadcast %90 : vector<1x128xf32> to vector<8x128xf32>
    %112 = arith.addf %110, %111 : vector<8x128xf32>
    %c0_69 = arith.constant 0 : index
    %c0_70 = arith.constant 0 : index
    %c0_71 = arith.constant 0 : index
    %113 = vector.load %arg23[%c0_69, %c0_70, %c0_71] : memref<1x8x128xf32, #tpu.memory_space<vmem>>, vector<1x8x128xf32>
    %114 = vector.shape_cast %113 : vector<1x8x128xf32> to vector<8x128xf32>
    %115 = vector.shape_cast %112 : vector<8x128xf32> to vector<1x8x128xf32>
    tpu.vector_store %arg23[%c0_69, %c0_70, %c0_71], %115 {strides = array<i32>} : memref<1x8x128xf32, #tpu.memory_space<vmem>>, vector<1x8x128xf32>,
    return
  }
  func.func @transform_0(%arg0: i32) -> (i32, i32, i32) {
    %c0_i32 = arith.constant 0 : i32
    %c0_i32_0 = arith.constant 0 : i32
    %c0_i32_1 = arith.constant 0 : i32
    return %arg0, %c0_i32, %c0_i32_0 : i32, i32, i32
  }
  func.func @transform_1(%arg0: i32) -> (i32, i32, i32) {
    %c0_i32 = arith.constant 0 : i32
    %c0_i32_0 = arith.constant 0 : i32
    %c0_i32_1 = arith.constant 0 : i32
    return %arg0, %c0_i32, %c0_i32_0 : i32, i32, i32
  }
  func.func @transform_2(%arg0: i32) -> (i32, i32, i32) {
    %c0_i32 = arith.constant 0 : i32
    %c0_i32_0 = arith.constant 0 : i32
    %c0_i32_1 = arith.constant 0 : i32
    return %arg0, %c0_i32, %c0_i32_0 : i32, i32, i32
  }
  func.func @transform_3(%arg0: i32) -> (i32, i32, i32) {
    %c0_i32 = arith.constant 0 : i32
    %c0_i32_0 = arith.constant 0 : i32
    %c0_i32_1 = arith.constant 0 : i32
    return %arg0, %c0_i32, %c0_i32_0 : i32, i32, i32
  }
  func.func @transform_4(%arg0: i32) -> (i32, i32) {
    %c0_i32 = arith.constant 0 : i32
    %c0_i32_0 = arith.constant 0 : i32
    %c0_i32_1 = arith.constant 0 : i32
    return %c0_i32, %c0_i32_0 : i32, i32
  }
  func.func @transform_5(%arg0: i32) -> (i32, i32) {
    %c0_i32 = arith.constant 0 : i32
    %c0_i32_0 = arith.constant 0 : i32
    %c0_i32_1 = arith.constant 0 : i32
    return %c0_i32, %c0_i32_0 : i32, i32
  }
  func.func @transform_6(%arg0: i32) -> (i32, i32) {
    %c0_i32 = arith.constant 0 : i32
    %c0_i32_0 = arith.constant 0 : i32
    %c0_i32_1 = arith.constant 0 : i32
    return %c0_i32, %c0_i32_0 : i32, i32
  }
  func.func @transform_7(%arg0: i32) -> (i32, i32) {
    %c0_i32 = arith.constant 0 : i32
    %c0_i32_0 = arith.constant 0 : i32
    %c0_i32_1 = arith.constant 0 : i32
    return %c0_i32, %c0_i32_0 : i32, i32
  }
  func.func @transform_8(%arg0: i32) -> (i32, i32) {
    %c0_i32 = arith.constant 0 : i32
    %c0_i32_0 = arith.constant 0 : i32
    %c0_i32_1 = arith.constant 0 : i32
    return %c0_i32, %c0_i32_0 : i32, i32
  }
  func.func @transform_9(%arg0: i32) -> (i32, i32) {
    %c0_i32 = arith.constant 0 : i32
    %c0_i32_0 = arith.constant 0 : i32
    %c0_i32_1 = arith.constant 0 : i32
    return %c0_i32, %c0_i32_0 : i32, i32
  }
  func.func @transform_10(%arg0: i32) -> (i32, i32) {
    %c0_i32 = arith.constant 0 : i32
    %c0_i32_0 = arith.constant 0 : i32
    %c0_i32_1 = arith.constant 0 : i32
    return %c0_i32, %c0_i32_0 : i32, i32
  }
  func.func @transform_11(%arg0: i32) -> (i32, i32) {
    %c0_i32 = arith.constant 0 : i32
    %c0_i32_0 = arith.constant 0 : i32
    %c0_i32_1 = arith.constant 0 : i32
    return %c0_i32, %c0_i32_0 : i32, i32
  }
  func.func @transform_12(%arg0: i32) -> (i32, i32) {
    %c0_i32 = arith.constant 0 : i32
    %c0_i32_0 = arith.constant 0 : i32
    %c0_i32_1 = arith.constant 0 : i32
    return %c0_i32, %c0_i32_0 : i32, i32
  }
  func.func @transform_13(%arg0: i32) -> (i32, i32) {
    %c0_i32 = arith.constant 0 : i32
    %c0_i32_0 = arith.constant 0 : i32
    %c0_i32_1 = arith.constant 0 : i32
    return %c0_i32, %c0_i32_0 : i32, i32
  }
  func.func @transform_14(%arg0: i32) -> (i32, i32) {
    %c0_i32 = arith.constant 0 : i32
    %c0_i32_0 = arith.constant 0 : i32
    %c0_i32_1 = arith.constant 0 : i32
    return %c0_i32, %c0_i32_0 : i32, i32
  }
  func.func @transform_15(%arg0: i32) -> (i32, i32) {
    %c0_i32 = arith.constant 0 : i32
    %c0_i32_0 = arith.constant 0 : i32
    %c0_i32_1 = arith.constant 0 : i32
    return %c0_i32, %c0_i32_0 : i32, i32
  }
  func.func @transform_16(%arg0: i32) -> (i32, i32) {
    %c0_i32 = arith.constant 0 : i32
    %c0_i32_0 = arith.constant 0 : i32
    %c0_i32_1 = arith.constant 0 : i32
    return %c0_i32, %c0_i32_0 : i32, i32
  }
  func.func @transform_17(%arg0: i32) -> (i32, i32) {
    %c0_i32 = arith.constant 0 : i32
    %c0_i32_0 = arith.constant 0 : i32
    %c0_i32_1 = arith.constant 0 : i32
    return %c0_i32, %c0_i32_0 : i32, i32
  }
  func.func @transform_18(%arg0: i32) -> (i32, i32) {
    %c0_i32 = arith.constant 0 : i32
    %c0_i32_0 = arith.constant 0 : i32
    %c0_i32_1 = arith.constant 0 : i32
    return %c0_i32, %c0_i32_0 : i32, i32
  }
  func.func @transform_19(%arg0: i32) -> (i32, i32) {
    %c0_i32 = arith.constant 0 : i32
    %c0_i32_0 = arith.constant 0 : i32
    %c0_i32_1 = arith.constant 0 : i32
    return %c0_i32, %c0_i32_0 : i32, i32
  }
  func.func @transform_20(%arg0: i32) -> (i32, i32) {
    %c0_i32 = arith.constant 0 : i32
    %c0_i32_0 = arith.constant 0 : i32
    %c0_i32_1 = arith.constant 0 : i32
    return %c0_i32, %c0_i32_0 : i32, i32
  }
  func.func @transform_21(%arg0: i32) -> (i32, i32) {
    %c0_i32 = arith.constant 0 : i32
    %c0_i32_0 = arith.constant 0 : i32
    %c0_i32_1 = arith.constant 0 : i32
    return %c0_i32, %c0_i32_0 : i32, i32
  }
  func.func @transform_22(%arg0: i32) -> (i32, i32, i32) {
    %c0_i32 = arith.constant 0 : i32
    %c0_i32_0 = arith.constant 0 : i32
    %c0_i32_1 = arith.constant 0 : i32
    return %arg0, %c0_i32, %c0_i32_0 : i32, i32, i32
  }
}

</mosaic_0001>

<bundles_post_ra>
// kernel: attn_module_forward.1
= control target key start
LH: loop header
LB: loop body
LE: loop exit
PB: predicated region body
PF: predicated region fallthrough
CT: control target
= control target key end

     0   :  { %s4238_s0 = inlined_call_operand.vmem [shape: f32[2,8,128], index: 0, kind: input, shape index: {}]   ;;  %s4239_s1 = inlined_call_operand.vmem [shape: f32[2,8,128], index: 1, kind: input, shape index: {}]   ;;  %s4240_s2 = inlined_call_operand.vmem [shape: f32[2,8,128], index: 2, kind: input, shape index: {}]   ;;  %s4241_s3 = inlined_call_operand.vmem [shape: f32[2,8,128], index: 3, kind: input, shape index: {}]   ;;  %s4242_s4 = inlined_call_operand.vmem [shape: f32[64,128], index: 4, kind: input, shape index: {}]   ;;  %s4243_s5 = inlined_call_operand.vmem [shape: f32[64,64], index: 5, kind: input, shape index: {}]   ;;  %s4244_s6 = inlined_call_operand.vmem [shape: f32[128,128], index: 6, kind: input, shape index: {}]   ;;  %s4245_s7 = inlined_call_operand.vmem [shape: f32[1,128], index: 7, kind: input, shape index: {}]   ;;  %s4246_s8 = inlined_call_operand.vmem [shape: f32[128,128], index: 8, kind: input, shape index: {}]   ;;  %s4247_s9 = inlined_call_operand.vmem [shape: f32[1,128], index: 9, kind: input, shape index: {}]   ;;  %s4248_s10 = inlined_call_operand.vmem [shape: f32[128,128], index: 10, kind: input, shape index: {}]   ;;  %s4249_s11 = inlined_call_operand.vmem [shape: f32[1,128], index: 11, kind: input, shape index: {}]   ;;  %s4250_s12 = inlined_call_operand.vmem [shape: f32[128,128], index: 12, kind: input, shape index: {}]   ;;  %s4251_s13 = inlined_call_operand.vmem [shape: f32[1,128], index: 13, kind: input, shape index: {}]   ;;  %s4252_s14 = inlined_call_operand.vmem [shape: f32[1,128], index: 14, kind: input, shape index: {}]   ;;  %s4253_s15 = inlined_call_operand.vmem [shape: f32[1,128], index: 15, kind: input, shape index: {}]   ;;  %s4254_s16 = inlined_call_operand.hbm [shape: f32[1024,128], index: 16, kind: input, shape index: {}]   ;;  %s4255_s17 = inlined_call_operand.vmem [shape: f32[1,1024], index: 17, kind: input, shape index: {}]   ;;  %s4256_s18 = inlined_call_operand.hbm [shape: f32[128,1024], index: 18, kind: input, shape index: {}]   ;;  %s4257_s19 = inlined_call_operand.vmem [shape: f32[1,128], index: 19, kind: input, shape index: {}]   ;;  %s4258_s20 = inlined_call_operand.vmem [shape: f32[1,128], index: 20, kind: input, shape index: {}]   ;;  %s4259_s21 = inlined_call_operand.vmem [shape: f32[1,128], index: 21, kind: input, shape index: {}]   ;;  %s4260_s22 = inlined_call_operand.hbm [shape: f32[2,8,128], index: 22, kind: output, shape index: {}]  }
   0x1   :  { %4274 = sst [smem:[#allocation17_spill]] %s4238_s0 }
   0x2   :  { %4275 = sst [smem:[#allocation18_spill]] %s4239_s1 }
   0x3   :  { %4276 = sst [smem:[#allocation19_spill]] %s4240_s2 }
   0x4   :  { %4277 = sst [smem:[#allocation20_spill]] %s4241_s3 }
   0x5   :  { %4278 = sst [smem:[#allocation21_spill]] %s4242_s4 }
   0x6   :  { %4279 = sst [smem:[#allocation22_spill]] %s4243_s5 }
   0x7   :  { %4280 = sst [smem:[#allocation23_spill]] %s4244_s6 }
   0x8   :  { %4281 = sst [smem:[#allocation24_spill]] %s4246_s8 }
   0x9   :  { %4282 = sst [smem:[#allocation25_spill]] %s4254_s16 }
   0xa   :  { %4283 = sst [smem:[#allocation26_spill]] %s4256_s18 }
   0xb   :  { %4284 = sst [smem:[#allocation27_spill]] %s4258_s20 }
   0xc   :  { %4285 = sst [smem:[#allocation28_spill]] %s4259_s21 }
   0xd   :  { %4286 = sst [smem:[#allocation29_spill]] %s4260_s22 }
   0xe   :  { %27 = vsyncpa [#allocation3], 0 }
   0xf   :  { %28 = vsyncpa [#allocation6], 0 }
  0x10   :  { %29 = vsyncpa [#allocation4], 0 }
  0x11   :  { %31 = vsyncpa [#allocation4 + $0x1], 0  ;;  %s3650_s3 = smov 0   ;;  %s3652_s28 = smov 0  }
  0x12   :  { %s3654_s29 = smov 0   ;;  %s3656_s30 = smov 0  }
  0x13 LB: > { %4287 = sst [smem:[#allocation11_spill]] %s3511_s3  ;;  %s3671_s4 = sadd.s32 4294967295, %s3523_s30   ;;  %s3523_s30 = sphi %s3656_s30, %s4321_s30   ;;  %s3519_s29 = sphi %s3654_s29, %s4323_s29   ;;  %s3515_s28 = sphi %s3652_s28, %s4325_s28   ;;  %s3511_s3 = sphi %s3650_s3, %s4324_s3  }
  0x14   : > { %4288 = sst [smem:[#allocation12_spill]] %s3519_s29  ;;  %s2478_s0 = sadd.s32 4294967294, %s3523_s30  }
  0x15   : > { %4289 = sst [smem:[#allocation13_spill]] %s3523_s30  ;;  %s3675_s23 = sadd.s32 1, %s3523_s30  }
  0x16   : > { %4290 = sst [smem:[#allocation14_spill]] %s3675_s23  ;;  %s526_s1 = sadd.s32 1, %s3519_s29 }
  0x17   : > { %s523_s5 = ssub.s32 %s3523_s30, %s3675_s23  ;;  %p536_p0 = scmp.ne.s32.totalorder %s3519_s29, %s3515_s28 }
  0x18   : > { %p524_p1 = scmp.eq.s32.totalorder %s523_s5, 0  ;;  %p537_p2 = scmp.eq.s32.totalorder %s3671_s4, 1 }
  0x19   : > { %p542_p3 = scmp.ne.s32.totalorder %s3515_s28, %s3511_s3  ;;  %p543_p4 = scmp.eq.s32.totalorder %s2478_s0, 1 }
  0x1a   : > { %s3686_s24 = scalar_select %p524_p1, %s3519_s29, %s526_s1  }
  0x1b   : > { %p3688_p5 = por %p537_p2, %p536_p0  ;;  %p3692_p6 = por %p543_p4, %p542_p3 }
  0x1c   : > { %4291 = sst [smem:[#allocation15_spill]] %s3686_s24  ;;  %p2479_p7 = scmp.ge.s32.totalorder %s3523_s30, 1 }
  0x1d   : > { %s4292_s6 = scalar_select %p3688_p5, 1, 0 }
  0x1e   : > { %s4293_s25 = scalar_select %p3692_p6, 1, 0 }
  0x1f   : > { %p550_p8 = scmp.lt.s32.totalorder %s3523_s30, 3  ;;  %p4270_p9 = scmp.eq.s32.totalorder %s3671_s4, 0 }
  0x20   : > { %4294 = sst [smem:[#allocation16_spill]] %s4293_s25  ;;  %s3525_s2 = smov [#allocation2]  }
  0x21   : > { %p3699_p10 = pnand %p2479_p7, %p550_p8  ;;  %s598_s27 = sshll.u32 %s3525_s2, 4  ;;  %s599_s27 = int_to_ptr.vmem [resolvable:$true] %s598_s27 }
  0x22   : > { %s3526_s1 = smov [#allocation5]   ;;  %s4297_s16 = sld [smem:[#allocation25_spill]] }
  0x23   : > { %s4295_s26 = scalar_select %p3699_p10, 1, 0 }
  0x24   : > { %p3332_p11 = pneg %p3699_p10  ;;  %s614_s5 = sshll.u32 %s3526_s1, 4  ;;  %s3711_s5 = int_to_ptr.vmem [resolvable:$true] %s614_s5 }
  0x26   : > { %p3707_p12 = pnand %p4270_p9, %p3332_p11 }
  0x28   : > { %s3397_s23 = scalar_lea.hbm %s4297_s16, 16384  ;;  %p3399_p0 = pneg %p3707_p12 }
  0x29   : > { %p3398_p13 = scmp.ne.s32.totalorder %s4297_s16, %s3397_s23  ;;  %p3404_p3 = scmp.lt.u32.totalorder %s3397_s23, %s4297_s16 }
  0x2b   : > { %p3400_p1 = pnand %p3399_p0, %p3398_p13 }
  0x2d   : > { %p3401_p2 = pneg %p3400_p1 }
  0x2f   : > { %p3406_p4 = pnand %p3404_p3, %p3401_p2 }
  0x31   : > { %3409 = shalt.err (!%p3406_p4)
}
  0x32   : > { %s3410_s1 = scalar_lea.vmem %s599_s27, 16384  ;;  %p3418_p9 = scmp.lt.s32.totalorder %s599_s27, %s599_s27 }
  0x33   : > { %p3411_p7 = scmp.ne.s32.totalorder %s599_s27, %s3410_s1  ;;  %p3419_p6 = scmp.lt.s32.totalorder %s3410_s1, %s3410_s1 }
  0x35   : > { %p3413_p8 = pnand %p3411_p7, %p3399_p0  ;;  %p3420_p5 = por %p3419_p6, %p3418_p9 }
  0x37   : > { %p3414_p11 = pneg %p3413_p8 }
  0x39   : > { %p3421_p10 = pnand %p3420_p5, %p3414_p11 }
  0x3b   : > { %3424 = shalt.err (!%p3421_p10)
}
  0x3c   : > { %s3527_s29 = smov 128   ;;  %s3528_s24 = smov 8  }
  0x3d   : > { %3335 = dma.hbm_to_vmem [thread:$0]  (!%p3707_p12), %s4297_s16, 16384, %s599_s27, [#allocation3], %s3527_s29, %s3527_s29, %s3528_s24  }
  0x3e   : > { %s4298_s18 = sld [smem:[#allocation26_spill]] }
  0x44   : > { %s3425_s2 = scalar_lea.hbm %s4298_s18, 16384 }
  0x45   : > { %p3426_p13 = scmp.ne.s32.totalorder %s4298_s18, %s3425_s2  ;;  %p3432_p9 = scmp.lt.u32.totalorder %s3425_s2, %s4298_s18 }
  0x47   : > { %p3428_p5 = pnand %p3426_p13, %p3399_p0 }
  0x49   : > { %p3429_p6 = pneg %p3428_p5 }
  0x4b   : > { %p3434_p10 = pnand %p3432_p9, %p3429_p6 }
  0x4d   : > { %3437 = shalt.err (!%p3434_p10)
}
  0x4e   : > { %s3438_s27 = scalar_lea.vmem %s3711_s5, 16384  ;;  %p3446_p4 = scmp.lt.s32.totalorder %s3711_s5, %s3711_s5 }
  0x4f   : > { %p3439_p1 = scmp.ne.s32.totalorder %s3711_s5, %s3438_s27  ;;  %p3447_p7 = scmp.lt.s32.totalorder %s3438_s27, %s3438_s27 }
  0x51   : > { %p3441_p2 = pnand %p3439_p1, %p3399_p0  ;;  %p3448_p8 = por %p3447_p7, %p3446_p4 }
  0x53   : > { %p3442_p3 = pneg %p3441_p2 }
  0x55   : > { %p3449_p11 = pnand %p3448_p8, %p3442_p3 }
  0x57   : > { %3452 = shalt.err (!%p3449_p11)
}
  0x58   : > { %s3529_s20 = smov 1024   ;;  %s3530_s21 = smov 64  }
  0x59   : > { %3338 = dma.hbm_to_vmem [thread:$0]  (!%p3707_p12), %s4298_s18, 16384, %s3711_s5, [#allocation6], %s3529_s20, %s3529_s20, %s3530_s21  }
  0x5a   : > { %p4299_p13 = scmp.ne.s32.totalorder %s4295_s26, 0 }
  0x5b   : > { %p4300_p0 = scmp.eq.s32.totalorder (!%p4299_p13), %s3671_s4, 0 }
  0x5c   : > { %667 = sbr.rel (%p4299_p13) target bundleno = 2587 (0xa1b), region = 108 }
  0x63   : > { %3498 = dma.done.wait (%p4300_p0), [#allocation3], 16384   ;;  %p4301_p5 = pmov %p4300_p0 }
  0x64   : > { %p4302_p6 = pmov %p4300_p0 }
  0x65   : > { %3500 = vsyncadd (%p4301_p5), [#allocation3], 4294950912 }
  0x66   : > { %3502 = dma.done.wait (%p4302_p6), [#allocation6], 16384   ;;  %p4303_p9 = pmov %p4300_p0 }
  0x67   : > { %v3531_v0 = vmov 0.0|0.0   ;;  %vm3532_vm0 = vmmov 0   ;;  %v3533_v1 = vmov 0.0   ;;  %s4304_s8 = sld [smem:[#allocation24_spill]]  ;;  %s4305_s23 = sld [smem:[#allocation23_spill]]  ;;  %vm1139_vm1 = vcmask 523264  }
  0x68   : > { %3504 = vsyncadd (%p4303_p9), [#allocation6], 4294950912  ;;  %2958 = vmatprep.subr.bf16.mxu1 %v3531_v0  ;;  %2934 = vmatprep.subr.bf16.mxu0 %v3531_v0  ;;  %p744_p12 = scmp.lt.s32.totalorder %s3671_s4, 1  ;;  %s4306_s22 = sld [smem:[#allocation19_spill]]  ;;  %v2492_v56 = vld [vmem:[%s4247_s9] ss:$0 sm:$0xff] }
  0x69   : > { %2804 = vmatprep.mubr.msk.f32.mxu1 %vm3532_vm0, %v3533_v1  ;;  %2769 = vmatprep.mubr.msk.f32.mxu0 %vm3532_vm0, %v3533_v1  ;;  %s4307_s24 = sld [smem:[#allocation20_spill]]  ;;  %s4308_s2 = sld [smem:[#allocation17_spill]] }
  0x6a   : > { %s745_s26 = scalar_select %p744_p12, %s3671_s4, 1 }
  0x6b   : > { %s4309_s27 = sld [smem:[#allocation18_spill]]  ;;  %s2503_s1 = sshll.u32 %s3671_s4, 7 }
  0x6c   : > { %s2487_s30 = sshll.u32 %s745_s26, 3  ;;  %s4315_s20 = sld [smem:[#allocation29_spill]] }
  0x6d   : > { %v859_v2 = vld [vmem:[%s4304_s8] sm:$0xff]  ;;  %v860_v3 = vld [vmem:[%s4304_s8 + $0x8] sm:$0xff]  ;;  %v861_v7 = vld [vmem:[%s4304_s8 + $0x10] sm:$0xff]  ;;  %p4316_p1 = scmp.ne.s32.totalorder %s4292_s6, 0  ;;  %s3534_s4 = smov [#allocation7]  }
  0x6e   : > { %v2959_v4 = vpack.c.bf16 %v860_v3, %v859_v2  ;;  %v766_v5 = vld [vmem:[%s4305_s23] sm:$0xff]  ;;  %v767_v6 = vld [vmem:[%s4305_s23 + $0x8] sm:$0xff]  ;;  %v862_v8 = vld [vmem:[%s4304_s8 + $0x18] sm:$0xff]  ;;  %s755_s29 = scalar_lea.vmem %s4306_s22, %s2487_s30  ;;  %s741_s22 = sand.u32 1, %s3515_s28  }
  0x6f   : > { %v2935_v9 = vpack.c.bf16 %v767_v6, %v766_v5  ;;  %v2962_v10 = vpack.c.bf16 %v862_v8, %v861_v7  ;;  %v768_v11 = vld [vmem:[%s4305_s23 + $0x10] sm:$0xff]  ;;  %v769_v12 = vld [vmem:[%s4305_s23 + $0x18] sm:$0xff]  ;;  %v863_v14 = vld [vmem:[%s4304_s8 + $0x20] sm:$0xff]  ;;  %s759_s26 = scalar_lea.vmem %s4307_s24, %s2487_s30  ;;  %s2348_s5 = scalar_lea.sflag [#allocation4], %s741_s22 }
  0x70   : > { %2960 = vmatpush3.bf16.xpose.msra.mxu1 %v2959_v4  ;;  %v2938_v13 = vpack.c.bf16 %v769_v12, %v768_v11  ;;  %v864_v15 = vld [vmem:[%s4304_s8 + $0x28] sm:$0xff]  ;;  %v770_v17 = vld [vmem:[%s4305_s23 + $0x20] sm:$0xff]  ;;  %v865_v20 = vld [vmem:[%s4304_s8 + $0x30] sm:$0xff] }
  0x71   : > { %2961 = vmatprep.subr.bf16.mxu1 %v3531_v0  ;;  %2936 = vmatpush3.bf16.xpose.msra.mxu0 %v2935_v9  ;;  %v2965_v16 = vpack.c.bf16 %v864_v15, %v863_v14  ;;  %v771_v18 = vld [vmem:[%s4305_s23 + $0x28] sm:$0xff]  ;;  %v866_v21 = vld [vmem:[%s4304_s8 + $0x38] sm:$0xff]  ;;  %v772_v23 = vld [vmem:[%s4305_s23 + $0x30] sm:$0xff]  ;;  %s751_s18 = scalar_lea.vmem %s4309_s27, %s2487_s30 }
  0x72   : > { %2937 = vmatprep.subr.bf16.mxu0 %v3531_v0  ;;  %v2941_v19 = vpack.c.bf16 %v771_v18, %v770_v17  ;;  %v2968_v22 = vpack.c.bf16 %v866_v21, %v865_v20  ;;  %v773_v24 = vld [vmem:[%s4305_s23 + $0x38] sm:$0xff]  ;;  %v867_v26 = vld [vmem:[%s4304_s8 + $0x40] sm:$0xff]  ;;  %v868_v27 = vld [vmem:[%s4304_s8 + $0x48] sm:$0xff]  ;;  %s4196_s21 = scalar_lea.hbm %s4315_s20, %s2503_s1 }
  0x73   : > { %v2944_v25 = vpack.c.bf16 %v773_v24, %v772_v23  ;;  %v2971_v28 = vpack.c.bf16 %v868_v27, %v867_v26  ;;  %v774_v29 = vld [vmem:[%s4305_s23 + $0x40] sm:$0xff]  ;;  %v775_v30 = vld [vmem:[%s4305_s23 + $0x48] sm:$0xff]  ;;  %v869_v32 = vld [vmem:[%s4304_s8 + $0x50] sm:$0xff] }
  0x74   : > { %v2947_v31 = vpack.c.bf16 %v775_v30, %v774_v29  ;;  %v870_v33 = vld [vmem:[%s4304_s8 + $0x58] sm:$0xff]  ;;  %v776_v35 = vld [vmem:[%s4305_s23 + $0x50] sm:$0xff]  ;;  %v871_v38 = vld [vmem:[%s4304_s8 + $0x60] sm:$0xff] }
  0x75   : > { %v2974_v34 = vpack.c.bf16 %v870_v33, %v869_v32  ;;  %v777_v36 = vld [vmem:[%s4305_s23 + $0x58] sm:$0xff]  ;;  %v872_v39 = vld [vmem:[%s4304_s8 + $0x68] sm:$0xff]  ;;  %v778_v41 = vld [vmem:[%s4305_s23 + $0x60] sm:$0xff] }
  0x76   : > { %v2950_v37 = vpack.c.bf16 %v777_v36, %v776_v35  ;;  %v2977_v40 = vpack.c.bf16 %v872_v39, %v871_v38  ;;  %v779_v42 = vld [vmem:[%s4305_s23 + $0x68] sm:$0xff]  ;;  %v873_v44 = vld [vmem:[%s4304_s8 + $0x70] sm:$0xff]  ;;  %v874_v45 = vld [vmem:[%s4304_s8 + $0x78] sm:$0xff]  ;;  %s747_s8 = scalar_lea.vmem %s4308_s2, %s2487_s30  ;;  %s4314_s2 = sld [smem:[#allocation28_spill]] }
  0x77   : > { %v2953_v43 = vpack.c.bf16 %v779_v42, %v778_v41  ;;  %v2980_v46 = vpack.c.bf16 %v874_v45, %v873_v44  ;;  %v780_v47 = vld [vmem:[%s4305_s23 + $0x70] sm:$0xff]  ;;  %v781_v48 = vld [vmem:[%s4305_s23 + $0x78] sm:$0xff]  ;;  %v3894_v50 = vld [vmem:[%s755_s29] sm:$0xff]  ;;  %s4311_s29 = sld [smem:[#allocation22_spill]] }
  0x78   : > { %2963 = vmatpush3.bf16.xpose.msra.mxu1 %v2962_v10  ;;  %v2956_v49 = vpack.c.bf16 %v781_v48, %v780_v47  ;;  %v764_v51 = vld [vmem:[%s759_s26] sm:$0xff]  ;;  %v953_v23 = vld [vmem:[%s4248_s10 + $0x8] sm:$0xff]  ;;  %v955_v26 = vld [vmem:[%s4248_s10 + $0x18] sm:$0xff]  ;;  %s4313_s26 = sld [smem:[#allocation27_spill]] }
  0x79   : > { %2964 = vmatprep.subr.bf16.mxu1 %v3531_v0  ;;  %2939 = vmatpush3.bf16.xpose.msra.mxu0 %v2938_v13  ;;  %v765_v52 = vadd.f32 %v764_v51, %v3894_v50  ;;  %v3904_v53 = vld [vmem:[%s747_s8] sm:$0xff]  ;;  %v957_v29 = vld [vmem:[%s4248_s10 + $0x28] sm:$0xff]  ;;  %v959_v32 = vld [vmem:[%s4248_s10 + $0x38] sm:$0xff] }
  0x7a   : > { %2940 = vmatprep.subr.bf16.mxu0 %v3531_v0  ;;  %v761_v54 = vld [vmem:[%s751_s18] sm:$0xff]  ;;  %s4310_s18 = sld [smem:[#allocation21_spill]]  ;;  %v961_v35 = vld [vmem:[%s4248_s10 + $0x48] sm:$0xff]  ;;  %v963_v38 = vld [vmem:[%s4248_s10 + $0x58] sm:$0xff] }
  0x7b   : > { %v762_v55 = vadd.f32 %v761_v54, %v3904_v53  ;;  %v2491_v20 = vld [vmem:[%s4245_s7] ss:$0 sm:$0xff]  ;;  %v965_v41 = vld [vmem:[%s4248_s10 + $0x68] sm:$0xff]  ;;  %v967_v44 = vld [vmem:[%s4248_s10 + $0x78] sm:$0xff] }
  0x7d   : > { %s4312_s0 = smov %s4311_s29 }
  0x7e   : > { %v1147_v51 = vld [vmem:[%s4312_s0 + $0x8] sm:$0xff]  ;;  %v1149_v54 = vld [vmem:[%s4312_s0 + $0x18] sm:$0xff] }
  0x80   : > { %2966 = vmatpush3.bf16.xpose.msra.mxu1 %v2965_v16  ;;  %v3918_v58 = vld [vmem:[%s4310_s18] sm:$0xff]  ;;  %v3923_v59 = vld [vmem:[%s4310_s18 + $0x8] sm:$0xff]  ;;  %v3930_v5 = vld [vmem:[%s4310_s18 + $0x10] sm:$0xff] }
  0x81   : > { %2967 = vmatprep.subr.bf16.mxu1 %v3531_v0  ;;  %2942 = vmatpush3.bf16.xpose.msra.mxu0 %v2941_v19  ;;  %v3935_v6 = vld [vmem:[%s4310_s18 + $0x18] sm:$0xff]  ;;  %v3943_v10 = vld [vmem:[%s4310_s18 + $0x20] sm:$0xff]  ;;  %v3948_v11 = vld [vmem:[%s4310_s18 + $0x28] sm:$0xff] }
  0x82   : > { %2943 = vmatprep.subr.bf16.mxu0 %v3531_v0  ;;  %v3956_v15 = vld [vmem:[%s4310_s18 + $0x30] sm:$0xff]  ;;  %v3961_v16 = vld [vmem:[%s4310_s18 + $0x38] sm:$0xff] }
  0x88   : > { %2969 = vmatpush3.bf16.xpose.msra.mxu1 %v2968_v22  ;;  %v952_v22 = vld [vmem:[%s4248_s10] sm:$0xff] }
  0x89   : > { %2970 = vmatprep.subr.bf16.mxu1 %v3531_v0  ;;  %2945 = vmatpush3.bf16.xpose.msra.mxu0 %v2944_v25  ;;  %v2983_v24 = vpack.c.bf16 %v953_v23, %v952_v22  ;;  %v954_v25 = vld [vmem:[%s4248_s10 + $0x10] sm:$0xff] }
  0x8a   : > { %2946 = vmatprep.subr.bf16.mxu0 %v3531_v0  ;;  %v2986_v27 = vpack.c.bf16 %v955_v26, %v954_v25  ;;  %v1307_v25 = vld [vmem:[%s4250_s12 + $0x20] sm:$0xff]  ;;  %v1308_v26 = vld [vmem:[%s4250_s12 + $0x28] sm:$0xff] }
  0x90   : > { %2972 = vmatpush3.bf16.xpose.msra.mxu1 %v2971_v28  ;;  %v956_v28 = vld [vmem:[%s4248_s10 + $0x20] sm:$0xff] }
  0x91   : > { %2973 = vmatprep.subr.bf16.mxu1 %v3531_v0  ;;  %2948 = vmatpush3.bf16.xpose.msra.mxu0 %v2947_v31  ;;  %v2989_v30 = vpack.c.bf16 %v957_v29, %v956_v28  ;;  %v958_v31 = vld [vmem:[%s4248_s10 + $0x30] sm:$0xff]  ;;  %v1310_v29 = vld [vmem:[%s4250_s12 + $0x38] sm:$0xff] }
  0x92   : > { %2949 = vmatprep.subr.bf16.mxu0 %v3531_v0  ;;  %v2992_v33 = vpack.c.bf16 %v959_v32, %v958_v31  ;;  %v1309_v28 = vld [vmem:[%s4250_s12 + $0x30] sm:$0xff]  ;;  %v1311_v31 = vld [vmem:[%s4250_s12 + $0x40] sm:$0xff]  ;;  %v1312_v32 = vld [vmem:[%s4250_s12 + $0x48] sm:$0xff] }
  0x98   : > { %2975 = vmatpush3.bf16.xpose.msra.mxu1 %v2974_v34  ;;  %v960_v34 = vld [vmem:[%s4248_s10 + $0x40] sm:$0xff] }
  0x99   : > { %2976 = vmatprep.subr.bf16.mxu1 %v3531_v0  ;;  %2951 = vmatpush3.bf16.xpose.msra.mxu0 %v2950_v37  ;;  %v2995_v36 = vpack.c.bf16 %v961_v35, %v960_v34  ;;  %v962_v37 = vld [vmem:[%s4248_s10 + $0x50] sm:$0xff]  ;;  %v1314_v35 = vld [vmem:[%s4250_s12 + $0x58] sm:$0xff] }
  0x9a   : > { %2952 = vmatprep.subr.bf16.mxu0 %v3531_v0  ;;  %v2998_v39 = vpack.c.bf16 %v963_v38, %v962_v37  ;;  %v1313_v34 = vld [vmem:[%s4250_s12 + $0x50] sm:$0xff]  ;;  %v1315_v37 = vld [vmem:[%s4250_s12 + $0x60] sm:$0xff]  ;;  %v1316_v38 = vld [vmem:[%s4250_s12 + $0x68] sm:$0xff] }
  0xa0   : > { %2978 = vmatpush3.bf16.xpose.msra.mxu1 %v2977_v40  ;;  %v964_v40 = vld [vmem:[%s4248_s10 + $0x60] sm:$0xff] }
  0xa1   : > { %2979 = vmatprep.subr.bf16.mxu1 %v3531_v0  ;;  %2954 = vmatpush3.bf16.xpose.msra.mxu0 %v2953_v43  ;;  %v3001_v42 = vpack.c.bf16 %v965_v41, %v964_v40  ;;  %v966_v43 = vld [vmem:[%s4248_s10 + $0x70] sm:$0xff]  ;;  %v1318_v41 = vld [vmem:[%s4250_s12 + $0x78] sm:$0xff] }
  0xa2   : > { %2955 = vmatprep.subr.bf16.mxu0 %v3531_v0  ;;  %v3004_v45 = vpack.c.bf16 %v967_v44, %v966_v43  ;;  %v1317_v40 = vld [vmem:[%s4250_s12 + $0x70] sm:$0xff] }
  0xa8   : > { %2981 = vmatpush3.bf16.xpose.msra.mxu1 %v2980_v46 }
  0xa9   : > { %3006 = vmatprep.subr.bf16.mxu1 %v3531_v0  ;;  %2957 = vmatpush3.bf16.xpose.msra.mxu0 %v2956_v49  ;;  %v1146_v49 = vld [vmem:[%s4311_s29] sm:$0xff]  ;;  %s2486_s29 = sshll.u32 %s741_s22, 3 }
  0xaa   : > { %2982 = vmatprep.subr.bf16.mxu0 %v3531_v0  ;;  %s743_s27 = scalar_lea.vmem [#allocation7], %s2486_s29  ;;  %s3457_s29 = sshll.u32 %s3534_s4, 4  ;;  %s3458_s29 = int_to_ptr.vmem [resolvable:$false] %s3457_s29 }
  0xab   : > { %s2361_s16 = sshll.u32 %s743_s27, 4  ;;  %s4198_s16 = int_to_ptr.vmem [resolvable:$true] %s2361_s16 }
  0xac   : > { %s3453_s24 = scalar_lea.vmem %s4198_s16, 128  ;;  %p3460_p4 = scmp.lt.s32.totalorder %s4198_s16, %s3458_s29 }
  0xad   : > { %p3454_p10 = scmp.ne.s32.totalorder %s4198_s16, %s3453_s24 }
  0xaf   : > { %2805 = vmatmul.mubr.f32.vlgmr.msra.gmra.mrb[0].mxu1 %v765_v52  ;;  %v3019_v52 = vpack.c.bf16 %v1147_v51, %v1146_v49  ;;  %v2496_v49 = vld [vmem:[%s4251_s13] ss:$0 sm:$0xff]  ;;  %p3455_p2 = pnand %p3454_p10, %p4316_p1 }
  0xb0   : > { %2858 = vmatprep.mubr.msk.f32.mxu1 %vm3532_vm0, %v3533_v1  ;;  %2770 = vmatmul.mubr.f32.vlgmr.msra.gmra.mrb[0].mxu0 %v762_v55 }
  0xb1   : > { %2839 = vmatprep.mubr.msk.f32.mxu0 %vm3532_vm0, %v3533_v1  ;;  %2984 = vmatpush3.bf16.xpose.msra.mxu0 %v2983_v24  ;;  %p3456_p3 = pneg %p3455_p2 }
  0xb2   : > { %2985 = vmatprep.subr.bf16.mxu0 %v3531_v0 }
  0xb9   : > { %2987 = vmatpush3.bf16.xpose.msra.mxu0 %v2986_v27  ;;  %v3049_v27 = vpack.c.bf16 %v1308_v26, %v1307_v25  ;;  %v1447_v25 = vld [vmem:[#allocation2 + $0xb0] sm:$0xff]  ;;  %v1448_v26 = vld [vmem:[#allocation2 + $0xb8] sm:$0xff] }
  0xba   : > { %2988 = vmatprep.subr.bf16.mxu0 %v3531_v0 }
  0xc1   : > { %2990 = vmatpush3.bf16.xpose.msra.mxu0 %v2989_v30  ;;  %v3052_v30 = vpack.c.bf16 %v1310_v29, %v1309_v28  ;;  %v1480_v28 = vld [vmem:[#allocation2 + $0x1b8] sm:$0xff] }
  0xc2   : > { %2991 = vmatprep.subr.bf16.mxu0 %v3531_v0 }
  0xc9   : > { %2993 = vmatpush3.bf16.xpose.msra.mxu0 %v2992_v33  ;;  %v3055_v33 = vpack.c.bf16 %v1312_v32, %v1311_v31  ;;  %v3078_v31 = vpack.c.bf16 %v1448_v26, %v1447_v25  ;;  %v1472_v25 = vld [vmem:[#allocation2 + $0x178] sm:$0xff] }
  0xca   : > { %2994 = vmatprep.subr.bf16.mxu0 %v3531_v0 }
  0xd1   : > { %2996 = vmatpush3.bf16.xpose.msra.mxu0 %v2995_v36  ;;  %v3058_v36 = vpack.c.bf16 %v1314_v35, %v1313_v34  ;;  %v1432_v34 = vld [vmem:[#allocation2 + $0x38] sm:$0xff]  ;;  %v1463_v35 = vld [vmem:[#allocation2 + $0x130] sm:$0xff] }
  0xd2   : > { %2997 = vmatprep.subr.bf16.mxu0 %v3531_v0 }
  0xd9   : > { %2999 = vmatpush3.bf16.xpose.msra.mxu0 %v2998_v39  ;;  %v3061_v39 = vpack.c.bf16 %v1316_v38, %v1315_v37  ;;  %v1449_v37 = vld [vmem:[#allocation2 + $0xc0] sm:$0xff]  ;;  %v1450_v38 = vld [vmem:[#allocation2 + $0xc8] sm:$0xff] }
  0xda   : > { %3000 = vmatprep.subr.bf16.mxu0 %v3531_v0 }
  0xe1   : > { %3002 = vmatpush3.bf16.xpose.msra.mxu0 %v3001_v42  ;;  %v3064_v42 = vpack.c.bf16 %v1318_v41, %v1317_v40  ;;  %v1482_v40 = vld [vmem:[#allocation2 + $0x1c8] sm:$0xff] }
  0xe2   : > { %3003 = vmatprep.subr.bf16.mxu0 %v3531_v0 }
  0xe9   : > { %3005 = vmatpush3.bf16.xpose.msra.mxu0 %v3004_v45 }
  0xea   : > { %3042 = vmatprep.subr.bf16.mxu0 %v3531_v0 }
  0xf0   : > { %2840 = vmatmul.mubr.f32.vlgmr.msra.gmra.mrb[2].mxu0 %v3894_v50  ;;  %v1148_v50 = vld [vmem:[%s4312_s0 + $0x10] sm:$0xff] }
  0xf1   : > { %2931 = vmatprep.mubr.msk.f32.mxu0 %vm3532_vm0, %v3533_v1  ;;  %v3022_v55 = vpack.c.bf16 %v1149_v54, %v1148_v50 }
 0x182   : > { %v948_v57 = vpop.f32.mrb[0].mxu1 }
 0x183   : > { %v949_v60 = vadd.f32 %v2492_v56, %v948_v57  ;;  %v2806_v61 = vpop.f32.mrb[1].mxu1  ;;  %v855_v2 = vpop.f32.mrb[0].mxu0  ;;  %v1150_v56 = vld [vmem:[%s4312_s0 + $0x20] sm:$0xff]  ;;  %v1151_v57 = vld [vmem:[%s4312_s0 + $0x28] sm:$0xff] }
 0x184   : > { %v2771_v3 = vpop.f32.mrb[1].mxu0  ;;  %v856_v21 = vadd.f32 %v2491_v20, %v855_v2  ;;  %v1152_v61 = vld [vmem:[%s4312_s0 + $0x30] sm:$0xff] }
 0x185   : > { %v1053_v62 = vmul.f32 %v3918_v58, %v949_v60  ;;  %v1054_v63 = vmul.f32 %v3923_v59, %v949_v60  ;;  %v1055_v7 = vmul.f32 %v3930_v5, %v949_v60  ;;  %v1056_v8 = vmul.f32 %v3935_v6, %v949_v60 }
 0x186   : > { %v1057_v12 = vmul.f32 %v3943_v10, %v949_v60  ;;  %v1058_v13 = vmul.f32 %v3948_v11, %v949_v60  ;;  %v1059_v17 = vmul.f32 %v3956_v15, %v949_v60  ;;  %v1060_v18 = vmul.f32 %v3961_v16, %v949_v60 }
 0x187   : > { %v3007_v4 = vpack.c.bf16 %v1054_v63, %v1053_v62  ;;  %v3010_v9 = vpack.c.bf16 %v1056_v8, %v1055_v7  ;;  %v3025_v60 = vpack.c.bf16 %v1151_v57, %v1150_v56  ;;  %v1153_v62 = vld [vmem:[%s4312_s0 + $0x38] sm:$0xff]  ;;  %v2493_v7 = vld [vmem:[%s4249_s11] ss:$0 sm:$0xff]  ;;  %v1442_v56 = vld [vmem:[#allocation2 + $0x88] sm:$0xff] }
 0x188   : > { %v3013_v14 = vpack.c.bf16 %v1058_v13, %v1057_v12  ;;  %v3016_v19 = vpack.c.bf16 %v1060_v18, %v1059_v17  ;;  %v3028_v63 = vpack.c.bf16 %v1153_v62, %v1152_v61  ;;  %v1473_v57 = vld [vmem:[#allocation2 + $0x180] sm:$0xff]  ;;  %v1474_v61 = vld [vmem:[#allocation2 + $0x188] sm:$0xff] }
 0x189   : > { %3008 = vmatpush3.bf16.xpose.msra.mxu1 %v3007_v4  ;;  %v1425_v62 = vld [vmem:[#allocation2] sm:$0xff] }
 0x18a   : > { %3009 = vmatprep.subr.bf16.mxu1 %v3531_v0 }
 0x191   : > { %3011 = vmatpush3.bf16.xpose.msra.mxu1 %v3010_v9 }
 0x192   : > { %3012 = vmatprep.subr.bf16.mxu1 %v3531_v0 }
 0x199   : > { %3014 = vmatpush3.bf16.xpose.msra.mxu1 %v3013_v14 }
 0x19a   : > { %3015 = vmatprep.subr.bf16.mxu1 %v3531_v0 }
 0x1a1   : > { %3017 = vmatpush3.bf16.xpose.msra.mxu1 %v3016_v19 }
 0x1a2   : > { %3018 = vmatprep.subr.bf16.mxu1 %v3531_v0 }
 0x1a8   : > { %2859 = vmatmul.mubr.f32.vlgmr.msra.gmra.mrb[2].mxu1 %v856_v21 }
 0x1a9   : > { %2877 = vmatprep.mubr.msk.f32.mxu1 %vm3532_vm0, %v3533_v1  ;;  %3020 = vmatpush3.bf16.msra.mxu1 %v3019_v52 }
 0x1aa   : > { %3021 = vmatprep.subr.bf16.mxu1 %v3531_v0 }
 0x1ad   : > { %3023 = vmatpush3.bf16.msra.mxu1 %v3022_v55  ;;  %v1441_v55 = vld [vmem:[#allocation2 + $0x80] sm:$0xff] }
 0x1ae   : > { %3024 = vmatprep.subr.bf16.mxu1 %v3531_v0 }
 0x1b1   : > { %3026 = vmatpush3.bf16.msra.mxu1 %v3025_v60  ;;  %v3066_v60 = vpack.c.bf16 %v1442_v56, %v1441_v55 }
 0x1b2   : > { %3027 = vmatprep.subr.bf16.mxu1 %v3531_v0 }
 0x1b5   : > { %3029 = vmatpush3.bf16.msra.mxu1 %v3028_v63  ;;  %v1426_v63 = vld [vmem:[#allocation2 + $0x8] sm:$0xff] }
 0x1b6   : > { %3030 = vmatprep.subr.bf16.mxu1 %v3531_v0 }
 0x1c3   : > { %v1041_v8 = vpop.f32.mrb[2].mxu0 }
 0x1c4   : > { %v1042_v9 = vadd.f32 %v2493_v7, %v1041_v8  ;;  %v2841_v12 = vpop.f32.mrb[3].mxu0  ;;  %v1458_v7 = vld [vmem:[#allocation2 + $0x108] sm:$0xff]  ;;  %v1443_v8 = vld [vmem:[#allocation2 + $0x90] sm:$0xff] }
 0x1c5   : > { %v1444_v12 = vld [vmem:[#allocation2 + $0x98] sm:$0xff] }
 0x1c6   : > { %v1061_v13 = vmul.f32 %v3918_v58, %v1042_v9  ;;  %v1062_v14 = vmul.f32 %v3923_v59, %v1042_v9  ;;  %v1063_v18 = vmul.f32 %v3930_v5, %v1042_v9  ;;  %v1064_v19 = vmul.f32 %v3935_v6, %v1042_v9 }
 0x1c7   : > { %v1065_v22 = vmul.f32 %v3943_v10, %v1042_v9  ;;  %v1066_v23 = vmul.f32 %v3948_v11, %v1042_v9  ;;  %v1067_v59 = vmul.f32 %v3956_v15, %v1042_v9  ;;  %v1068_v5 = vmul.f32 %v3961_v16, %v1042_v9  ;;  %v1303_v10 = vld [vmem:[%s4250_s12] sm:$0xff]  ;;  %v1305_v15 = vld [vmem:[%s4250_s12 + $0x10] sm:$0xff]  ;;  %v1306_v16 = vld [vmem:[%s4250_s12 + $0x18] sm:$0xff] }
 0x1c8   : > { %v3031_v17 = vpack.c.bf16 %v1062_v14, %v1061_v13  ;;  %v3034_v21 = vpack.c.bf16 %v1064_v19, %v1063_v18  ;;  %v3046_v24 = vpack.c.bf16 %v1306_v16, %v1305_v15  ;;  %v1475_v13 = vld [vmem:[#allocation2 + $0x190] sm:$0xff]  ;;  %v3070_v14 = vpack.c.bf16 %v1444_v12, %v1443_v8  ;;  %v1428_v19 = vld [vmem:[#allocation2 + $0x18] sm:$0xff]  ;;  %v1430_v15 = vld [vmem:[#allocation2 + $0x28] sm:$0xff] }
 0x1c9   : > { %v3037_v58 = vpack.c.bf16 %v1066_v23, %v1065_v22  ;;  %v3040_v6 = vpack.c.bf16 %v1068_v5, %v1067_v59  ;;  %v1427_v18 = vld [vmem:[#allocation2 + $0x10] sm:$0xff]  ;;  %v1445_v22 = vld [vmem:[#allocation2 + $0xa0] sm:$0xff]  ;;  %v1446_v23 = vld [vmem:[#allocation2 + $0xa8] sm:$0xff] }
 0x1ca   : > { %v1478_v59 = vld [vmem:[#allocation2 + $0x1a8] sm:$0xff]  ;;  %v3072_v5 = vpack.c.bf16 %v1428_v19, %v1427_v18  ;;  %v1461_v16 = vld [vmem:[#allocation2 + $0x120] sm:$0xff] }
 0x1cb   : > { %v1453_v12 = vld [vmem:[#allocation2 + $0xe0] sm:$0xff]  ;;  %v1438_v19 = vld [vmem:[#allocation2 + $0x68] sm:$0xff] }
 0x1cc   : > { %v1437_v18 = vld [vmem:[#allocation2 + $0x60] sm:$0xff] }
 0x27b   : > { %v1135_v46 = vpop.f32.mrb[2].mxu1 }
 0x27c   : > { %v2860_v47 = vpop.f32.mrb[3].mxu1  ;;  %v1140_v48 = vsel %vm1139_vm1, %v1135_v46, -inf }
 0x27d   : > { %1141 = vmax.xlane.f32.xlu0 %v1140_v48 }
 0x30a   : > { %v1142_v2 = vpop.xlane.xlu0 %1141 }
 0x30b   : > { %v1143_v3 = vsub.f32 %v1135_v46, %v1142_v2  ;;  %v3098_v2 = vpack.c.bf16 %v1474_v61, %v1473_v57  ;;  %v1436_v61 = vld [vmem:[#allocation2 + $0x58] sm:$0xff] }
 0x30d   : > { %v1144_v4 = vmul.f32 1.442695, %v1143_v3  ;;  %v3068_v3 = vpack.c.bf16 %v1426_v63, %v1425_v62  ;;  %v1467_v62 = vld [vmem:[#allocation2 + $0x150] sm:$0xff]  ;;  %v1468_v63 = vld [vmem:[#allocation2 + $0x158] sm:$0xff] }
 0x30f   : > { %3389 = vpow2.f32 %v1144_v4  ;;  %v1457_v4 = vld [vmem:[#allocation2 + $0x100] sm:$0xff] }
 0x310   : > { %v3100_v9 = vpack.c.bf16 %v1458_v7, %v1457_v4 }
 0x319   : > { %v3390_v20 = vpop.eup %3389 }
 0x31a   : > { %2878 = vmatmul.mubr.msk.f32.vlgmr.msra.gmra.mrb[4].mxu1 %vm1139_vm1, %v3390_v20 }
 0x31b   : > { %3032 = vmatpush3.bf16.msra.mxu1 %v3031_v17  ;;  %2896 = vmatprep.mubr.msk.f32.mxu1 %vm3532_vm0, %v3533_v1  ;;  %v1304_v1 = vld [vmem:[%s4250_s12 + $0x8] sm:$0xff] }
 0x31c   : > { %3033 = vmatprep.subr.bf16.mxu1 %v3531_v0  ;;  %v3043_v11 = vpack.c.bf16 %v1304_v1, %v1303_v10  ;;  %v3074_v10 = vpack.c.bf16 %v1446_v23, %v1445_v22  ;;  %v1469_v22 = vld [vmem:[#allocation2 + $0x160] sm:$0xff]  ;;  %v1470_v23 = vld [vmem:[#allocation2 + $0x168] sm:$0xff] }
 0x31e   : > { %3044 = vmatpush3.bf16.xpose.msra.mxu0 %v3043_v11  ;;  %v1429_v11 = vld [vmem:[#allocation2 + $0x20] sm:$0xff] }
 0x31f   : > { %3035 = vmatpush3.bf16.msra.mxu1 %v3034_v21  ;;  %3045 = vmatprep.subr.bf16.mxu0 %v3531_v0  ;;  %v1460_v21 = vld [vmem:[#allocation2 + $0x118] sm:$0xff]  ;;  %v3076_v29 = vpack.c.bf16 %v1430_v15, %v1429_v11 }
 0x320   : > { %3036 = vmatprep.subr.bf16.mxu1 %v3531_v0  ;;  %v1440_v11 = vld [vmem:[#allocation2 + $0x78] sm:$0xff] }
 0x323   : > { %3038 = vmatpush3.bf16.msra.mxu1 %v3037_v58  ;;  %v1477_v58 = vld [vmem:[#allocation2 + $0x1a0] sm:$0xff] }
 0x324   : > { %3039 = vmatprep.subr.bf16.mxu1 %v3531_v0  ;;  %v3106_v1 = vpack.c.bf16 %v1478_v59, %v1477_v58  ;;  %v3124_v58 = vpack.c.bf16 %v1470_v23, %v1469_v22  ;;  %v1455_v59 = vld [vmem:[#allocation2 + $0xf0] sm:$0xff] }
 0x326   : > { %3047 = vmatpush3.bf16.xpose.msra.mxu0 %v3046_v24  ;;  %v1462_v24 = vld [vmem:[#allocation2 + $0x128] sm:$0xff] }
 0x327   : > { %3041 = vmatpush3.bf16.msra.mxu1 %v3040_v6  ;;  %3048 = vmatprep.subr.bf16.mxu0 %v3531_v0 }
 0x328   : > { %3067 = vmatprep.subr.bf16.mxu1 %v3066_v60  ;;  %v1435_v60 = vld [vmem:[#allocation2 + $0x50] sm:$0xff] }
 0x32e   : > { %3050 = vmatpush3.bf16.xpose.msra.mxu0 %v3049_v27  ;;  %v1479_v27 = vld [vmem:[#allocation2 + $0x1b0] sm:$0xff] }
 0x32f   : > { %3051 = vmatprep.subr.bf16.mxu0 %v3531_v0  ;;  %v3110_v32 = vpack.c.bf16 %v1480_v28, %v1479_v27  ;;  %v1505_v27 = vld [vmem:[#allocation2 + $0x280] sm:$0xff]  ;;  %v1506_v28 = vld [vmem:[#allocation2 + $0x288] sm:$0xff] }
 0x336   : > { %3053 = vmatpush3.bf16.xpose.msra.mxu0 %v3052_v30  ;;  %v3108_v30 = vpack.c.bf16 %v1462_v24, %v1461_v16  ;;  %v1471_v24 = vld [vmem:[#allocation2 + $0x170] sm:$0xff] }
 0x337   : > { %3054 = vmatprep.subr.bf16.mxu0 %v3531_v0  ;;  %v3128_v26 = vpack.c.bf16 %v1472_v25, %v1471_v24 }
 0x33e   : > { %3056 = vmatpush3.bf16.xpose.msra.mxu0 %v3055_v33  ;;  %v1431_v33 = vld [vmem:[#allocation2 + $0x30] sm:$0xff] }
 0x33f   : > { %3057 = vmatprep.subr.bf16.mxu0 %v3531_v0  ;;  %v3080_v41 = vpack.c.bf16 %v1432_v34, %v1431_v33 }
 0x346   : > { %3059 = vmatpush3.bf16.xpose.msra.mxu0 %v3058_v36  ;;  %v1464_v36 = vld [vmem:[#allocation2 + $0x138] sm:$0xff] }
 0x347   : > { %3060 = vmatprep.subr.bf16.mxu0 %v3531_v0 }
 0x34e   : > { %3062 = vmatpush3.bf16.xpose.msra.mxu0 %v3061_v39  ;;  %v1481_v39 = vld [vmem:[#allocation2 + $0x1c0] sm:$0xff] }
 0x34f   : > { %3063 = vmatprep.subr.bf16.mxu0 %v3531_v0 }
 0x356   : > { %3065 = vmatpush3.bf16.xpose.msra.mxu0 %v3064_v42  ;;  %v3112_v42 = vpack.c.bf16 %v1464_v36, %v1463_v35 }
 0x357   : > { %3099 = vmatprep.subr.bf16.mxu0 %v3098_v2  ;;  %v3088_v2 = vpack.c.bf16 %v1436_v61, %v1435_v60  ;;  %v1524_v60 = vld [vmem:[#allocation2 + $0x318] sm:$0xff]  ;;  %v1509_v61 = vld [vmem:[#allocation2 + $0x2a0] sm:$0xff] }
 0x3ed   : > { %v1223_v43 = vpop.f32.mrb[4].mxu1 }
 0x3ee   : > { %v1227_v44 = vmax.f32 %v1223_v43, 1e-30  ;;  %v2879_v45 = vpop.f32.mrb[5].mxu1  ;;  %v3082_v43 = vpack.c.bf16 %v1450_v38, %v1449_v37  ;;  %v2497_v37 = vld [vmem:[%s4252_s14] ss:$0 sm:$0xff] }
 0x3ef   : > { %v1433_v45 = vld [vmem:[#allocation2 + $0x40] sm:$0xff] }
 0x3f0   : > { %3391 = vrcp.f32 %v1227_v44  ;;  %v3114_v44 = vpack.c.bf16 %v1482_v40, %v1481_v39  ;;  %v2498_v38 = vld [vmem:[%s4253_s15] ss:$0 sm:$0xff] }
 0x3f1   : > { %v1489_v40 = vld [vmem:[#allocation2 + $0x200] sm:$0xff] }
 0x3fa   : > { %v3392_v46 = vpop.eup %3391 }
 0x3fb   : > { %v1229_v47 = vmul.f32 %v3392_v46, %v3390_v20  ;;  %v1459_v20 = vld [vmem:[#allocation2 + $0x110] sm:$0xff]  ;;  %v1434_v46 = vld [vmem:[#allocation2 + $0x48] sm:$0xff] }
 0x3fc   : > { %v3104_v6 = vpack.c.bf16 %v1460_v21, %v1459_v20  ;;  %v3092_v21 = vpack.c.bf16 %v1438_v19, %v1437_v18  ;;  %v1543_v18 = vld [vmem:[#allocation2 + $0x3b0] sm:$0xff]  ;;  %v1544_v19 = vld [vmem:[#allocation2 + $0x3b8] sm:$0xff] }
 0x3fd   : > { %2897 = vmatmul.mubr.msk.f32.vlgmr.msra.gmra.mrb[6].mxu1 %vm1139_vm1, %v1229_v47  ;;  %v1465_v47 = vld [vmem:[#allocation2 + $0x140] sm:$0xff]  ;;  %v3174_v23 = vpack.c.bf16 %v1544_v19, %v1543_v18 }
 0x3fe   : > { %3069 = vmatpush3.bf16.xpose.msra.mxu1 %v3068_v3  ;;  %v3120_v3 = vpack.c.bf16 %v1468_v63, %v1467_v62  ;;  %v1510_v62 = vld [vmem:[#allocation2 + $0x2a8] sm:$0xff]  ;;  %v1541_v63 = vld [vmem:[#allocation2 + $0x3a0] sm:$0xff] }
 0x3ff   : > { %3071 = vmatprep.subr.bf16.mxu1 %v3070_v14 }
 0x406   : > { %3073 = vmatpush3.bf16.xpose.msra.mxu1 %v3072_v5  ;;  %v1487_v5 = vld [vmem:[#allocation2 + $0x1f0] sm:$0xff] }
 0x407   : > { %3075 = vmatprep.subr.bf16.mxu1 %v3074_v10  ;;  %v1488_v10 = vld [vmem:[#allocation2 + $0x1f8] sm:$0xff] }
 0x408   : > { %v3126_v15 = vpack.c.bf16 %v1488_v10, %v1487_v5  ;;  %v1528_v5 = vld [vmem:[#allocation2 + $0x338] sm:$0xff]  ;;  %v1514_v10 = vld [vmem:[#allocation2 + $0x2c8] sm:$0xff] }
 0x40e   : > { %3077 = vmatpush3.bf16.xpose.msra.mxu1 %v3076_v29  ;;  %v1537_v29 = vld [vmem:[#allocation2 + $0x380] sm:$0xff] }
 0x40f   : > { %3079 = vmatprep.subr.bf16.mxu1 %v3078_v31  ;;  %v1538_v31 = vld [vmem:[#allocation2 + $0x388] sm:$0xff] }
 0x416   : > { %3081 = vmatpush3.bf16.xpose.msra.mxu1 %v3080_v41  ;;  %v1490_v41 = vld [vmem:[#allocation2 + $0x208] sm:$0xff] }
 0x417   : > { %3083 = vmatprep.subr.bf16.mxu1 %v3082_v43  ;;  %v1522_v43 = vld [vmem:[#allocation2 + $0x308] sm:$0xff] }
 0x4d0   : > { %v1299_v48 = vpop.f32.mrb[6].mxu1 }
 0x4d1   : > { %v2898_v0 = vpop.f32.mrb[7].mxu1  ;;  %2932 = vmatmul.mubr.f32.vlgmr.msra.gmra.mrb[4].mxu0 %v1299_v48  ;;  %v1466_v48 = vld [vmem:[#allocation2 + $0x148] sm:$0xff] }
 0x4d2   : > { %3101 = vmatpush3.bf16.xpose.msra.mxu0 %v3100_v9  ;;  %v1451_v0 = vld [vmem:[#allocation2 + $0xd0] sm:$0xff]  ;;  %v3116_v55 = vpack.c.bf16 %v1466_v48, %v1465_v47  ;;  %v1540_v48 = vld [vmem:[#allocation2 + $0x398] sm:$0xff] }
 0x4d3   : > { %v1539_v47 = vld [vmem:[#allocation2 + $0x390] sm:$0xff] }
 0x5a4   : > { %v1392_v51 = vpop.f32.mrb[4].mxu0 }
 0x5a5   : > { %v1393_v52 = vadd.f32 %v2496_v49, %v1392_v51  ;;  %v2933_v50 = vpop.f32.mrb[5].mxu0  ;;  %v1452_v49 = vld [vmem:[#allocation2 + $0xd8] sm:$0xff]  ;;  %v1483_v51 = vld [vmem:[#allocation2 + $0x1d0] sm:$0xff] }
 0x5a6   : > { %v3084_v50 = vpack.c.bf16 %v1434_v46, %v1433_v45  ;;  %v3086_v56 = vpack.c.bf16 %v1452_v49, %v1451_v0  ;;  %v1507_v45 = vld [vmem:[#allocation2 + $0x290] sm:$0xff]  ;;  %v1508_v46 = vld [vmem:[#allocation2 + $0x298] sm:$0xff]  ;;  %v3132_v49 = vpack.c.bf16 %v1490_v41, %v1489_v40 }
 0x5a7   : > { %v4137_v54 = vadd.f32 %v1393_v52, %v3904_v53  ;;  %v1476_v53 = vld [vmem:[#allocation2 + $0x198] sm:$0xff]  ;;  %v1531_v40 = vld [vmem:[#allocation2 + $0x350] sm:$0xff] }
 0x5a8   : > { %v3102_v17 = vpack.c.bf16 %v1476_v53, %v1475_v13  ;;  %v1484_v52 = vld [vmem:[#allocation2 + $0x1d8] sm:$0xff]  ;;  %3085 = vmatpush3.bf16.xpose.msra.mxu1 %v3084_v50  ;;  %v1454_v13 = vld [vmem:[#allocation2 + $0xe8] sm:$0xff]  ;;  %v1485_v53 = vld [vmem:[#allocation2 + $0x1e0] sm:$0xff]  ;;  %v3166_v50 = vpack.c.bf16 %v1540_v48, %v1539_v47 }
 0x5a9   : > { %1399 = vadd.xlane.f32.xlu0 %v4137_v54  ;;  %v3118_v57 = vpack.c.bf16 %v1484_v52, %v1483_v51  ;;  %3087 = vmatprep.subr.bf16.mxu1 %v3086_v56  ;;  %v3090_v14 = vpack.c.bf16 %v1454_v13, %v1453_v12  ;;  %v3134_v52 = vpack.c.bf16 %v1508_v46, %v1507_v45  ;;  %v1492_v56 = vld [vmem:[#allocation2 + $0x218] sm:$0xff]  ;;  %v1494_v12 = vld [vmem:[#allocation2 + $0x228] sm:$0xff]  ;;  %v1525_v13 = vld [vmem:[#allocation2 + $0x320] sm:$0xff] }
 0x5aa   : > { %3103 = vmatprep.subr.bf16.mxu0 %v3102_v17  ;;  %v1486_v17 = vld [vmem:[#allocation2 + $0x1e8] sm:$0xff]  ;;  %v1532_v41 = vld [vmem:[#allocation2 + $0x358] sm:$0xff] }
 0x5ab   : > { %3105 = vmatpush3.bf16.xpose.msra.mxu0 %v3104_v6  ;;  %v3122_v20 = vpack.c.bf16 %v1486_v17, %v1485_v53  ;;  %v1526_v53 = vld [vmem:[#allocation2 + $0x328] sm:$0xff]  ;;  %v1512_v17 = vld [vmem:[#allocation2 + $0x2b8] sm:$0xff]  ;;  %v3184_v47 = vpack.c.bf16 %v1532_v41, %v1531_v40 }
 0x5ac   : > { %3107 = vmatprep.subr.bf16.mxu0 %v3106_v1  ;;  %v1439_v1 = vld [vmem:[#allocation2 + $0x70] sm:$0xff]  ;;  %v1550_v45 = vld [vmem:[#allocation2 + $0x3e8] sm:$0xff]  ;;  %v1954_v41 = vld [vmem:[#allocation5 + $0x198] sm:$0xff] }
 0x5ad   : > { %v3096_v16 = vpack.c.bf16 %v1440_v11, %v1439_v1  ;;  %v1545_v1 = vld [vmem:[#allocation2 + $0x3c0] sm:$0xff]  ;;  %v1546_v11 = vld [vmem:[#allocation2 + $0x3c8] sm:$0xff] }
 0x5ae   : > { %v3178_v25 = vpack.c.bf16 %v1546_v11, %v1545_v1  ;;  %v1960_v40 = vld [vmem:[#allocation5 + $0x1c8] sm:$0xff] }
 0x5b0   : > { %3089 = vmatpush3.bf16.xpose.msra.mxu1 %v3088_v2  ;;  %v1542_v2 = vld [vmem:[#allocation2 + $0x3a8] sm:$0xff] }
 0x5b1   : > { %3091 = vmatprep.subr.bf16.mxu1 %v3090_v14  ;;  %v1511_v14 = vld [vmem:[#allocation2 + $0x2b0] sm:$0xff] }
 0x5b2   : > { %v3142_v22 = vpack.c.bf16 %v1512_v17, %v1511_v14  ;;  %v1914_v14 = vld [vmem:[#allocation5 + $0x58] sm:$0xff] }
 0x5b3   : > { %3109 = vmatpush3.bf16.xpose.msra.mxu0 %v3108_v30  ;;  %v3130_v30 = vpack.c.bf16 %v1506_v28, %v1505_v27  ;;  %v1498_v27 = vld [vmem:[#allocation2 + $0x248] sm:$0xff]  ;;  %v1529_v28 = vld [vmem:[#allocation2 + $0x340] sm:$0xff] }
 0x5b4   : > { %3111 = vmatprep.subr.bf16.mxu0 %v3110_v32  ;;  %v3162_v32 = vpack.c.bf16 %v1538_v31, %v1537_v29  ;;  %v1530_v29 = vld [vmem:[#allocation2 + $0x348] sm:$0xff]  ;;  %v1516_v31 = vld [vmem:[#allocation2 + $0x2d8] sm:$0xff] }
 0x5b8   : > { %3093 = vmatpush3.bf16.xpose.msra.mxu1 %v3092_v21  ;;  %v3172_v21 = vpack.c.bf16 %v1526_v53, %v1525_v13  ;;  %v1912_v13 = vld [vmem:[#allocation5 + $0x48] sm:$0xff]  ;;  %v1906_v53 = vld [vmem:[#allocation5 + $0x18] sm:$0xff] }
 0x5bb   : > { %3113 = vmatpush3.bf16.xpose.msra.mxu0 %v3112_v42  ;;  %v1521_v42 = vld [vmem:[#allocation2 + $0x300] sm:$0xff] }
 0x5bc   : > { %3115 = vmatprep.subr.bf16.mxu0 %v3114_v44  ;;  %v3164_v51 = vpack.c.bf16 %v1522_v43, %v1521_v42  ;;  %v1517_v42 = vld [vmem:[#allocation2 + $0x2e0] sm:$0xff]  ;;  %v1518_v43 = vld [vmem:[#allocation2 + $0x2e8] sm:$0xff] }
 0x5bd   : > { %v3154_v48 = vpack.c.bf16 %v1518_v43, %v1517_v42  ;;  %v1962_v42 = vld [vmem:[#allocation5 + $0x1d8] sm:$0xff] }
 0x5c3   : > { %3117 = vmatpush3.bf16.xpose.msra.mxu0 %v3116_v55  ;;  %v1491_v55 = vld [vmem:[#allocation2 + $0x210] sm:$0xff] }
 0x5c4   : > { %3119 = vmatprep.subr.bf16.mxu0 %v3118_v57  ;;  %v1523_v57 = vld [vmem:[#allocation2 + $0x310] sm:$0xff] }
 0x5cb   : > { %3121 = vmatpush3.bf16.xpose.msra.mxu0 %v3120_v3  ;;  %v3136_v3 = vpack.c.bf16 %v1492_v56, %v1491_v55  ;;  %v1534_v55 = vld [vmem:[#allocation2 + $0x368] sm:$0xff]  ;;  %v1519_v56 = vld [vmem:[#allocation2 + $0x2f0] sm:$0xff] }
 0x5cc   : > { %3123 = vmatprep.subr.bf16.mxu0 %v3122_v20 }
 0x5d3   : > { %3125 = vmatpush3.bf16.xpose.msra.mxu0 %v3124_v58  ;;  %v1495_v58 = vld [vmem:[#allocation2 + $0x230] sm:$0xff] }
 0x5d4   : > { %3127 = vmatprep.subr.bf16.mxu0 %v3126_v15 }
 0x5db   : > { %3129 = vmatpush3.bf16.xpose.msra.mxu0 %v3128_v26  ;;  %v1497_v26 = vld [vmem:[#allocation2 + $0x240] sm:$0xff] }
 0x5dc   : > { %3163 = vmatprep.subr.bf16.mxu0 %v3162_v32  ;;  %v1547_v32 = vld [vmem:[#allocation2 + $0x3d0] sm:$0xff] }
 0x636   : > { %v1400_v4 = vpop.xlane.xlu0 %1399 }
 0x637   : > { %v1402_v7 = vmul.f32 0.0078125, %v1400_v4  ;;  %v3168_v4 = vpack.c.bf16 %v1524_v60, %v1523_v57  ;;  %v1520_v57 = vld [vmem:[#allocation2 + $0x2f8] sm:$0xff]  ;;  %v1551_v60 = vld [vmem:[#allocation2 + $0x3f0] sm:$0xff] }
 0x639   : > { %v1403_v8 = vsub.f32 %v4137_v54, %v1402_v7  ;;  %v1456_v54 = vld [vmem:[#allocation2 + $0xf8] sm:$0xff]  ;;  %v3138_v7 = vpack.c.bf16 %v1510_v62, %v1509_v61 }
 0x63a   : > { %v3094_v6 = vpack.c.bf16 %v1456_v54, %v1455_v59  ;;  %v1496_v59 = vld [vmem:[#allocation2 + $0x238] sm:$0xff]  ;;  %v1527_v54 = vld [vmem:[#allocation2 + $0x330] sm:$0xff] }
 0x63b   : > { %v1404_v9 = vmul.f32 %v1403_v8, %v1403_v8  ;;  %v3144_v15 = vpack.c.bf16 %v1496_v59, %v1495_v58  ;;  %v1552_v61 = vld [vmem:[#allocation2 + $0x3f8] sm:$0xff]  ;;  %v1913_v58 = vld [vmem:[#allocation5 + $0x50] sm:$0xff]  ;;  %v1920_v59 = vld [vmem:[#allocation5 + $0x88] sm:$0xff] }
 0x63c   : > { %3095 = vmatprep.subr.bf16.mxu1 %v3094_v6  ;;  %v1513_v6 = vld [vmem:[#allocation2 + $0x2c0] sm:$0xff] }
 0x63d   : > { %1405 = vadd.xlane.f32.xlu1 %v1404_v9  ;;  %3097 = vmatpush3.bf16.xpose.msra.mxu1 %v3096_v16  ;;  %v1493_v9 = vld [vmem:[#allocation2 + $0x220] sm:$0xff]  ;;  %v3176_v16 = vpack.c.bf16 %v1528_v5, %v1527_v54  ;;  %v3146_v24 = vpack.c.bf16 %v1514_v10, %v1513_v6  ;;  %v1928_v54 = vld [vmem:[#allocation5 + $0xc8] sm:$0xff]  ;;  %v1922_v5 = vld [vmem:[#allocation5 + $0x98] sm:$0xff] }
 0x63e   : > { %3131 = vmatprep.subr.bf16.mxu1 %v3130_v30  ;;  %v3140_v20 = vpack.c.bf16 %v1494_v12, %v1493_v9  ;;  %v1515_v30 = vld [vmem:[#allocation2 + $0x2d0] sm:$0xff]  ;;  %v1536_v9 = vld [vmem:[#allocation2 + $0x378] sm:$0xff]  ;;  %v1904_v12 = vld [vmem:[#allocation5 + $0x8] sm:$0xff]  ;;  %v3198_v11 = vpack.c.bf16 %v1928_v54, %v1920_v59 }
 0x63f   : > { %v3194_v19 = vpack.c.bf16 %v1912_v13, %v1904_v12  ;;  %v1930_v6 = vld [vmem:[#allocation5 + $0xd8] sm:$0xff] }
 0x640   : > { %v1994_v12 = vld [vmem:[#allocation5 + $0x2d8] sm:$0xff] }
 0x641   : > { %v2010_v59 = vld [vmem:[#allocation5 + $0x358] sm:$0xff] }
 0x6ca   : > { %v1406_v33 = vpop.xlane.xlu1 %1405 }
 0x6cb   : > { %v1407_v34 = vmul.f32 0.0078125, %v1406_v33  ;;  %v1548_v33 = vld [vmem:[#allocation2 + $0x3d8] sm:$0xff] }
 0x6cd   : > { %v1408_v35 = vadd.f32 1e-05, %v1407_v34  ;;  %v3148_v34 = vpack.c.bf16 %v1498_v27, %v1497_v26  ;;  %v1929_v26 = vld [vmem:[#allocation5 + $0xd0] sm:$0xff]  ;;  %v1936_v27 = vld [vmem:[#allocation5 + $0x108] sm:$0xff] }
 0x6cf   : > { %3393 = vrsqrt.f32 %v1408_v35  ;;  %v3180_v35 = vpack.c.bf16 %v1530_v29, %v1529_v28  ;;  %v1944_v28 = vld [vmem:[#allocation5 + $0x148] sm:$0xff]  ;;  %v1938_v29 = vld [vmem:[#allocation5 + $0x118] sm:$0xff] }
 0x6d9   : > { %v3394_v36 = vpop.eup %3393 }
 0x6da   : > { %v1410_v39 = vmul.f32 %v3394_v36, %v1403_v8  ;;  %v3170_v8 = vpack.c.bf16 %v1542_v2, %v1541_v63  ;;  %v3150_v36 = vpack.c.bf16 %v1516_v31, %v1515_v30  ;;  %v3158_v2 = vpack.c.bf16 %v1520_v57, %v1519_v56  ;;  %v1946_v30 = vld [vmem:[#allocation5 + $0x158] sm:$0xff] }
 0x6db   : > { %v1978_v56 = vld [vmem:[#allocation5 + $0x258] sm:$0xff] }
 0x6dc   : > { %v1417_v44 = vmul.f32 %v2497_v37, %v1410_v39  ;;  %v3182_v37 = vpack.c.bf16 %v1548_v33, %v1547_v32  ;;  %v1500_v39 = vld [vmem:[#allocation2 + $0x258] sm:$0xff]  ;;  %v3202_v33 = vpack.c.bf16 %v1944_v28, %v1936_v27 }
 0x6dd   : > { %v2026_v27 = vld [vmem:[#allocation5 + $0x3d8] sm:$0xff] }
 0x6de   : > { %v4147_v0 = vadd.f32 %v2498_v38, %v1417_v44  ;;  %v1499_v38 = vld [vmem:[#allocation2 + $0x250] sm:$0xff]  ;;  %v1549_v44 = vld [vmem:[#allocation2 + $0x3e0] sm:$0xff] }
 0x6df   : > { %v3152_v46 = vpack.c.bf16 %v1500_v39, %v1499_v38  ;;  %v1945_v38 = vld [vmem:[#allocation5 + $0x150] sm:$0xff]  ;;  %v1952_v39 = vld [vmem:[#allocation5 + $0x188] sm:$0xff] }
 0x6e0   : > { %2633 = vmatprep.mubr.f32.mxu1 %v4147_v0  ;;  %2667 = vmatprep.mubr.f32.mxu0 %v4147_v0 }
 0x6e1   : > { %2634 = vmatmul.mubr.f32.vlgmr.msra.gmra.mrb[8].mxu1 %v4147_v0  ;;  %2668 = vmatmul.mubr.f32.vlgmr.msra.gmra.mrb[6].mxu0 %v4147_v0 }
 0x6e2   : > { %3133 = vmatpush3.bf16.xpose.msra.mxu1 %v3132_v49  ;;  %3165 = vmatpush3.bf16.xpose.msra.mxu0 %v3164_v51  ;;  %v3186_v49 = vpack.c.bf16 %v1550_v45, %v1549_v44  ;;  %v1501_v51 = vld [vmem:[#allocation2 + $0x260] sm:$0xff]  ;;  %v3206_v45 = vpack.c.bf16 %v1960_v40, %v1952_v39  ;;  %v1918_v39 = vld [vmem:[#allocation5 + $0x78] sm:$0xff] }
 0x6e3   : > { %2701 = vmatprep.mubr.f32.mxu1 %v4147_v0  ;;  %2735 = vmatprep.mubr.f32.mxu0 %v4147_v0 }
 0x6e4   : > { %3135 = vmatprep.subr.bf16.mxu1 %v3134_v52  ;;  %3167 = vmatprep.subr.bf16.mxu0 %v3166_v50  ;;  %v1502_v52 = vld [vmem:[#allocation2 + $0x268] sm:$0xff]  ;;  %v1533_v50 = vld [vmem:[#allocation2 + $0x360] sm:$0xff] }
 0x6e5   : > { %v3156_v62 = vpack.c.bf16 %v1502_v52, %v1501_v51  ;;  %v3188_v63 = vpack.c.bf16 %v1534_v55, %v1533_v50  ;;  %v1961_v51 = vld [vmem:[#allocation5 + $0x1d0] sm:$0xff]  ;;  %v1968_v52 = vld [vmem:[#allocation5 + $0x208] sm:$0xff]  ;;  %v1970_v55 = vld [vmem:[#allocation5 + $0x218] sm:$0xff] }
 0x6e6   : > { %v1976_v50 = vld [vmem:[#allocation5 + $0x248] sm:$0xff] }
 0x6ea   : > { %3137 = vmatpush3.bf16.xpose.msra.mxu1 %v3136_v3  ;;  %3169 = vmatpush3.bf16.xpose.msra.mxu0 %v3168_v4  ;;  %v3190_v3 = vpack.c.bf16 %v1552_v61, %v1551_v60  ;;  %v1503_v4 = vld [vmem:[#allocation2 + $0x270] sm:$0xff]  ;;  %v3210_v61 = vpack.c.bf16 %v1976_v50, %v1968_v52 }
 0x6eb   : > { %3139 = vmatprep.subr.bf16.mxu1 %v3138_v7  ;;  %3171 = vmatprep.subr.bf16.mxu0 %v3170_v8  ;;  %v1504_v7 = vld [vmem:[#allocation2 + $0x278] sm:$0xff]  ;;  %v1535_v8 = vld [vmem:[#allocation2 + $0x370] sm:$0xff] }
 0x6ec   : > { %v3160_v17 = vpack.c.bf16 %v1504_v7, %v1503_v4  ;;  %v3192_v18 = vpack.c.bf16 %v1536_v9, %v1535_v8  ;;  %v1977_v4 = vld [vmem:[#allocation5 + $0x250] sm:$0xff]  ;;  %v1984_v7 = vld [vmem:[#allocation5 + $0x288] sm:$0xff]  ;;  %v1986_v9 = vld [vmem:[#allocation5 + $0x298] sm:$0xff] }
 0x6ed   : > { %v1992_v8 = vld [vmem:[#allocation5 + $0x2c8] sm:$0xff] }
 0x6f2   : > { %3141 = vmatpush3.bf16.xpose.msra.mxu1 %v3140_v20  ;;  %3173 = vmatpush3.bf16.xpose.msra.mxu0 %v3172_v21  ;;  %v3226_v20 = vpack.c.bf16 %v1914_v14, %v1906_v53  ;;  %v1903_v21 = vld [vmem:[#allocation5] sm:$0xff]  ;;  %v3214_v14 = vpack.c.bf16 %v1992_v8, %v1984_v7  ;;  %v1909_v7 = vld [vmem:[#allocation5 + $0x30] sm:$0xff] }
 0x6f3   : > { %3143 = vmatprep.subr.bf16.mxu1 %v3142_v22  ;;  %3175 = vmatprep.subr.bf16.mxu0 %v3174_v23  ;;  %v1911_v22 = vld [vmem:[#allocation5 + $0x40] sm:$0xff]  ;;  %v1905_v23 = vld [vmem:[#allocation5 + $0x10] sm:$0xff] }
 0x6f4   : > { %v3196_v10 = vpack.c.bf16 %v1911_v22, %v1903_v21  ;;  %v3228_v1 = vpack.c.bf16 %v1913_v58, %v1905_v23  ;;  %v1993_v21 = vld [vmem:[#allocation5 + $0x2d0] sm:$0xff]  ;;  %v2000_v22 = vld [vmem:[#allocation5 + $0x308] sm:$0xff]  ;;  %v2002_v58 = vld [vmem:[#allocation5 + $0x318] sm:$0xff] }
 0x6f5   : > { %v2008_v23 = vld [vmem:[#allocation5 + $0x348] sm:$0xff]  ;;  %v1917_v8 = vld [vmem:[#allocation5 + $0x70] sm:$0xff] }
 0x6fa   : > { %3145 = vmatpush3.bf16.xpose.msra.mxu1 %v3144_v15  ;;  %3177 = vmatpush3.bf16.xpose.msra.mxu0 %v3176_v16  ;;  %v3230_v15 = vpack.c.bf16 %v1930_v6, %v1922_v5  ;;  %v1919_v16 = vld [vmem:[#allocation5 + $0x80] sm:$0xff]  ;;  %v3218_v6 = vpack.c.bf16 %v2008_v23, %v2000_v22  ;;  %v3292_v23 = vpack.c.bf16 %v1917_v8, %v1909_v7  ;;  %v1996_v7 = vld [vmem:[#allocation5 + $0x2e8] sm:$0xff]  ;;  %v1990_v8 = vld [vmem:[#allocation5 + $0x2b8] sm:$0xff] }
 0x6fb   : > { %3147 = vmatprep.subr.bf16.mxu1 %v3146_v24  ;;  %3179 = vmatprep.subr.bf16.mxu0 %v3178_v25  ;;  %v1927_v24 = vld [vmem:[#allocation5 + $0xc0] sm:$0xff]  ;;  %v1921_v25 = vld [vmem:[#allocation5 + $0x90] sm:$0xff] }
 0x6fc   : > { %v3200_v31 = vpack.c.bf16 %v1927_v24, %v1919_v16  ;;  %v3232_v32 = vpack.c.bf16 %v1929_v26, %v1921_v25  ;;  %v2009_v16 = vld [vmem:[#allocation5 + $0x350] sm:$0xff]  ;;  %v2016_v24 = vld [vmem:[#allocation5 + $0x388] sm:$0xff]  ;;  %v2018_v26 = vld [vmem:[#allocation5 + $0x398] sm:$0xff] }
 0x6fd   : > { %v2024_v25 = vld [vmem:[#allocation5 + $0x3c8] sm:$0xff] }
 0x702   : > { %3149 = vmatpush3.bf16.xpose.msra.mxu1 %v3148_v34  ;;  %3181 = vmatpush3.bf16.xpose.msra.mxu0 %v3180_v35  ;;  %v3234_v34 = vpack.c.bf16 %v1946_v30, %v1938_v29  ;;  %v1935_v35 = vld [vmem:[#allocation5 + $0x100] sm:$0xff]  ;;  %v3222_v30 = vpack.c.bf16 %v2024_v25, %v2016_v24  ;;  %v1940_v24 = vld [vmem:[#allocation5 + $0x128] sm:$0xff] }
 0x703   : > { %3151 = vmatprep.subr.bf16.mxu1 %v3150_v36  ;;  %3183 = vmatprep.subr.bf16.mxu0 %v3182_v37  ;;  %v1943_v36 = vld [vmem:[#allocation5 + $0x140] sm:$0xff]  ;;  %v1937_v37 = vld [vmem:[#allocation5 + $0x110] sm:$0xff]  ;;  %v1948_v25 = vld [vmem:[#allocation5 + $0x168] sm:$0xff] }
 0x704   : > { %v3204_v43 = vpack.c.bf16 %v1943_v36, %v1935_v35  ;;  %v3236_v44 = vpack.c.bf16 %v1945_v38, %v1937_v37  ;;  %v2025_v35 = vld [vmem:[#allocation5 + $0x3d0] sm:$0xff]  ;;  %v1908_v36 = vld [vmem:[#allocation5 + $0x28] sm:$0xff]  ;;  %v1910_v38 = vld [vmem:[#allocation5 + $0x38] sm:$0xff] }
 0x705   : > { %v1916_v37 = vld [vmem:[#allocation5 + $0x68] sm:$0xff] }
 0x70a   : > { %3153 = vmatpush3.bf16.xpose.msra.mxu1 %v3152_v46  ;;  %3185 = vmatpush3.bf16.xpose.msra.mxu0 %v3184_v47  ;;  %v3238_v46 = vpack.c.bf16 %v1962_v42, %v1954_v41  ;;  %v1951_v47 = vld [vmem:[#allocation5 + $0x180] sm:$0xff]  ;;  %v3258_v42 = vpack.c.bf16 %v1916_v37, %v1908_v36  ;;  %v1956_v36 = vld [vmem:[#allocation5 + $0x1a8] sm:$0xff] }
 0x70b   : > { %3155 = vmatprep.subr.bf16.mxu1 %v3154_v48  ;;  %3187 = vmatprep.subr.bf16.mxu0 %v3186_v49  ;;  %v1959_v48 = vld [vmem:[#allocation5 + $0x1c0] sm:$0xff]  ;;  %v1953_v49 = vld [vmem:[#allocation5 + $0x190] sm:$0xff]  ;;  %v1964_v37 = vld [vmem:[#allocation5 + $0x1e8] sm:$0xff] }
 0x70c   : > { %v3208_v57 = vpack.c.bf16 %v1959_v48, %v1951_v47  ;;  %v3240_v60 = vpack.c.bf16 %v1961_v51, %v1953_v49  ;;  %v4164_v48 = vld [vmem:[%s4255_s17] sm:$0xff] }
 0x712   : > { %3157 = vmatpush3.bf16.xpose.msra.mxu1 %v3156_v62  ;;  %3189 = vmatpush3.bf16.xpose.msra.mxu0 %v3188_v63  ;;  %v3242_v62 = vpack.c.bf16 %v1978_v56, %v1970_v55  ;;  %v1967_v63 = vld [vmem:[#allocation5 + $0x200] sm:$0xff] }
 0x713   : > { %3159 = vmatprep.subr.bf16.mxu1 %v3158_v2  ;;  %3191 = vmatprep.subr.bf16.mxu0 %v3190_v3  ;;  %v1975_v2 = vld [vmem:[#allocation5 + $0x240] sm:$0xff]  ;;  %v1969_v3 = vld [vmem:[#allocation5 + $0x210] sm:$0xff] }
 0x714   : > { %v3212_v13 = vpack.c.bf16 %v1975_v2, %v1967_v63  ;;  %v3244_v53 = vpack.c.bf16 %v1977_v4, %v1969_v3 }
 0x71a   : > { %3161 = vmatpush3.bf16.xpose.msra.mxu1 %v3160_v17  ;;  %3193 = vmatpush3.bf16.xpose.msra.mxu0 %v3192_v18  ;;  %v3246_v17 = vpack.c.bf16 %v1994_v12, %v1986_v9  ;;  %v1983_v18 = vld [vmem:[#allocation5 + $0x280] sm:$0xff]  ;;  %v1924_v9 = vld [vmem:[#allocation5 + $0xa8] sm:$0xff] }
 0x71b   : > { %3195 = vmatprep.subr.bf16.mxu1 %v3194_v19  ;;  %3227 = vmatprep.subr.bf16.mxu0 %v3226_v20  ;;  %v1991_v19 = vld [vmem:[#allocation5 + $0x2c0] sm:$0xff]  ;;  %v1985_v20 = vld [vmem:[#allocation5 + $0x290] sm:$0xff] }
 0x71c   : > { %v3216_v54 = vpack.c.bf16 %v1991_v19, %v1983_v18  ;;  %v3248_v5 = vpack.c.bf16 %v1993_v21, %v1985_v20 }
 0x721   : > { %2702 = vmatmul.mubr.f32.vlgmr.msra.gmra.mrb[10].mxu1 %v4147_v0  ;;  %2736 = vmatmul.mubr.f32.vlgmr.msra.gmra.mrb[8].mxu0 %v4147_v0 }
 0x722   : > { %3197 = vmatpush1.bf16.xpose.msra.mxu1 %v3196_v10  ;;  %3229 = vmatpush1.bf16.xpose.msra.mxu0 %v3228_v1  ;;  %v3250_v10 = vpack.c.bf16 %v2010_v59, %v2002_v58  ;;  %v1999_v1 = vld [vmem:[#allocation5 + $0x300] sm:$0xff] }
 0x723   : > { %3199 = vmatprep.subr.bf16.mxu1 %v3198_v11  ;;  %3231 = vmatprep.subr.bf16.mxu0 %v3230_v15  ;;  %v2007_v11 = vld [vmem:[#allocation5 + $0x340] sm:$0xff]  ;;  %v2001_v15 = vld [vmem:[#allocation5 + $0x310] sm:$0xff] }
 0x724   : > { %v3220_v28 = vpack.c.bf16 %v2007_v11, %v1999_v1  ;;  %v3252_v29 = vpack.c.bf16 %v2009_v16, %v2001_v15  ;;  %v1923_v1 = vld [vmem:[#allocation5 + $0xa0] sm:$0xff]  ;;  %v1925_v15 = vld [vmem:[#allocation5 + $0xb0] sm:$0xff] }
 0x725   : > { %v1931_v11 = vld [vmem:[#allocation5 + $0xe0] sm:$0xff]  ;;  %v1933_v16 = vld [vmem:[#allocation5 + $0xf0] sm:$0xff] }
 0x72a   : > { %3201 = vmatpush1.bf16.xpose.msra.mxu1 %v3200_v31  ;;  %3233 = vmatpush1.bf16.xpose.msra.mxu0 %v3232_v32  ;;  %v3254_v31 = vpack.c.bf16 %v2026_v27, %v2018_v26  ;;  %v2015_v32 = vld [vmem:[#allocation5 + $0x380] sm:$0xff]  ;;  %v1942_v26 = vld [vmem:[#allocation5 + $0x138] sm:$0xff] }
 0x72b   : > { %3203 = vmatprep.subr.bf16.mxu1 %v3202_v33  ;;  %3235 = vmatprep.subr.bf16.mxu0 %v3234_v34  ;;  %v2023_v33 = vld [vmem:[#allocation5 + $0x3c0] sm:$0xff]  ;;  %v2017_v34 = vld [vmem:[#allocation5 + $0x390] sm:$0xff]  ;;  %v1950_v27 = vld [vmem:[#allocation5 + $0x178] sm:$0xff] }
 0x72c   : > { %v3224_v40 = vpack.c.bf16 %v2023_v33, %v2015_v32  ;;  %v3256_v41 = vpack.c.bf16 %v2025_v35, %v2017_v34  ;;  %v1939_v32 = vld [vmem:[#allocation5 + $0x120] sm:$0xff]  ;;  %v1941_v34 = vld [vmem:[#allocation5 + $0x130] sm:$0xff] }
 0x72d   : > { %v1947_v33 = vld [vmem:[#allocation5 + $0x160] sm:$0xff]  ;;  %v1949_v35 = vld [vmem:[#allocation5 + $0x170] sm:$0xff] }
 0x732   : > { %3205 = vmatpush1.bf16.xpose.msra.mxu1 %v3204_v43  ;;  %3237 = vmatpush1.bf16.xpose.msra.mxu0 %v3236_v44  ;;  %v3290_v43 = vpack.c.bf16 %v1918_v39, %v1910_v38  ;;  %v1555_v44 = vlaneseq  ;;  %v1958_v38 = vld [vmem:[#allocation5 + $0x1b8] sm:$0xff] }
 0x733   : > { %3207 = vmatprep.subr.bf16.mxu1 %v3206_v45  ;;  %3239 = vmatprep.subr.bf16.mxu0 %v3238_v46  ;;  %v1966_v39 = vld [vmem:[#allocation5 + $0x1f8] sm:$0xff] }
 0x734   : > { %v4157_v45 = vshrl.u32 %v1555_v44, 7  ;;  %v1955_v44 = vld [vmem:[#allocation5 + $0x1a0] sm:$0xff] }
 0x736   : > { %v1557_v46 = vsub.s32 0, %v4157_v45  ;;  %v1565_v47 = vsub.s32 2, %v4157_v45  ;;  %v1561_v49 = vsub.s32 1, %v4157_v45  ;;  %v1569_v51 = vsub.s32 3, %v4157_v45 }
 0x738   : > { %v1558_v52 = vrot.slane %v4164_v48, %v1557_v46  ;;  %v1566_v50 = vrot.slane %v4164_v48, %v1565_v47  ;;  %v1562_v55 = vrot.slane %v4164_v48, %v1561_v49  ;;  %v1570_v56 = vrot.slane %v4164_v48, %v1569_v51  ;;  %v1963_v46 = vld [vmem:[#allocation5 + $0x1e0] sm:$0xff]  ;;  %v1957_v47 = vld [vmem:[#allocation5 + $0x1b0] sm:$0xff]  ;;  %v1972_v51 = vld [vmem:[#allocation5 + $0x228] sm:$0xff] }
 0x739   : > { %v1965_v49 = vld [vmem:[#allocation5 + $0x1f0] sm:$0xff] }
 0x73a   : > { %3209 = vmatpush1.bf16.xpose.msra.mxu1 %v3208_v57  ;;  %3241 = vmatpush1.bf16.xpose.msra.mxu0 %v3240_v60 }
 0x73b   : > { %3211 = vmatprep.subr.bf16.mxu1 %v3210_v61  ;;  %3243 = vmatprep.subr.bf16.mxu0 %v3242_v62  ;;  %v1907_v61 = vld [vmem:[#allocation5 + $0x20] sm:$0xff] }
 0x73c   : > { %v1915_v62 = vld [vmem:[#allocation5 + $0x60] sm:$0xff] }
 0x73d   : > { %v3260_v22 = vpack.c.bf16 %v1915_v62, %v1907_v61  ;;  %v1971_v62 = vld [vmem:[#allocation5 + $0x220] sm:$0xff] }
 0x742   : > { %3213 = vmatpush1.bf16.xpose.msra.mxu1 %v3212_v13  ;;  %3245 = vmatpush1.bf16.xpose.msra.mxu0 %v3244_v53  ;;  %v1932_v53 = vld [vmem:[#allocation5 + $0xe8] sm:$0xff] }
 0x743   : > { %3215 = vmatprep.subr.bf16.mxu1 %v3214_v14  ;;  %3247 = vmatprep.subr.bf16.mxu0 %v3246_v17  ;;  %v1926_v14 = vld [vmem:[#allocation5 + $0xb8] sm:$0xff] }
 0x744   : > { %v1934_v17 = vld [vmem:[#allocation5 + $0xf8] sm:$0xff] }
 0x74a   : > { %3217 = vmatpush1.bf16.xpose.msra.mxu1 %v3216_v54  ;;  %3249 = vmatpush1.bf16.xpose.msra.mxu0 %v3248_v5  ;;  %v3262_v54 = vpack.c.bf16 %v1932_v53, %v1924_v9  ;;  %v3294_v5 = vpack.c.bf16 %v1934_v17, %v1926_v14  ;;  %v1998_v9 = vld [vmem:[#allocation5 + $0x2f8] sm:$0xff]  ;;  %v1987_v17 = vld [vmem:[#allocation5 + $0x2a0] sm:$0xff] }
 0x74b   : > { %3219 = vmatprep.subr.bf16.mxu1 %v3218_v6  ;;  %3251 = vmatprep.subr.bf16.mxu0 %v3250_v10  ;;  %v3310_v14 = vpack.c.bf16 %v1998_v9, %v1990_v8 }
 0x752   : > { %3221 = vmatpush1.bf16.xpose.msra.mxu1 %v3220_v28  ;;  %3253 = vmatpush1.bf16.xpose.msra.mxu0 %v3252_v29  ;;  %v3264_v28 = vpack.c.bf16 %v1931_v11, %v1923_v1  ;;  %v3296_v29 = vpack.c.bf16 %v1933_v16, %v1925_v15  ;;  %v2011_v1 = vld [vmem:[#allocation5 + $0x360] sm:$0xff]  ;;  %v2005_v11 = vld [vmem:[#allocation5 + $0x330] sm:$0xff]  ;;  %v2020_v16 = vld [vmem:[#allocation5 + $0x3a8] sm:$0xff] }
 0x753   : > { %3223 = vmatprep.subr.bf16.mxu1 %v3222_v30  ;;  %3255 = vmatprep.subr.bf16.mxu0 %v3254_v31  ;;  %v3266_v30 = vpack.c.bf16 %v1948_v25, %v1940_v24  ;;  %v3298_v31 = vpack.c.bf16 %v1950_v27, %v1942_v26  ;;  %v2013_v15 = vld [vmem:[#allocation5 + $0x370] sm:$0xff]  ;;  %v2028_v24 = vld [vmem:[#allocation5 + $0x3e8] sm:$0xff]  ;;  %v2022_v25 = vld [vmem:[#allocation5 + $0x3b8] sm:$0xff] }
 0x754   : > { %v2030_v26 = vld [vmem:[#allocation5 + $0x3f8] sm:$0xff] }
 0x75a   : > { %3225 = vmatpush1.bf16.xpose.msra.mxu1 %v3224_v40  ;;  %3257 = vmatpush1.bf16.xpose.msra.mxu0 %v3256_v41  ;;  %v3268_v40 = vpack.c.bf16 %v1947_v33, %v1939_v32  ;;  %v3300_v41 = vpack.c.bf16 %v1949_v35, %v1941_v34  ;;  %v1581_v32 = vsub.s32 6, %v4157_v45  ;;  %v2019_v33 = vld [vmem:[#allocation5 + $0x3a0] sm:$0xff]  ;;  %v1577_v34 = vsub.s32 5, %v4157_v45 }
 0x75b   : > { %3259 = vmatprep.subr.bf16.mxu1 %v3258_v42  ;;  %3291 = vmatprep.subr.bf16.mxu0 %v3290_v43  ;;  %v3270_v42 = vpack.c.bf16 %v1964_v37, %v1956_v36  ;;  %v3302_v43 = vpack.c.bf16 %v1966_v39, %v1958_v38  ;;  %v1585_v35 = vsub.s32 7, %v4157_v45  ;;  %v2027_v36 = vld [vmem:[#allocation5 + $0x3e0] sm:$0xff]  ;;  %v2021_v37 = vld [vmem:[#allocation5 + $0x3b0] sm:$0xff] }
 0x75c   : > { %v2029_v38 = vld [vmem:[#allocation5 + $0x3f0] sm:$0xff] }
 0x7b4   : > { %v1661_v57 = vpop.f32.mrb[8].mxu1  ;;  %v1732_v60 = vpop.f32.mrb[6].mxu0 }
 0x7b5   : > { %v1662_v63 = vadd.f32 %v1661_v57, %v1558_v52  ;;  %v1733_v2 = vadd.f32 %v1732_v60, %v1566_v50  ;;  %v1663_v3 = vpop.f32.mrb[9].mxu1  ;;  %v1734_v4 = vpop.f32.mrb[7].mxu0  ;;  %v1980_v52 = vld [vmem:[#allocation5 + $0x268] sm:$0xff]  ;;  %v1974_v50 = vld [vmem:[#allocation5 + $0x238] sm:$0xff]  ;;  %v3304_v57 = vpack.c.bf16 %v1965_v49, %v1957_v47 }
 0x7b6   : > { %v1664_v12 = vadd.f32 %v1663_v3, %v1562_v55  ;;  %v1735_v13 = vadd.f32 %v1734_v4, %v1570_v56  ;;  %v1982_v55 = vld [vmem:[#allocation5 + $0x278] sm:$0xff]  ;;  %v3272_v56 = vpack.c.bf16 %v1963_v46, %v1955_v44  ;;  %v3274_v60 = vpack.c.bf16 %v1980_v52, %v1972_v51  ;;  %v1981_v3 = vld [vmem:[#allocation5 + $0x270] sm:$0xff]  ;;  %v1988_v4 = vld [vmem:[#allocation5 + $0x2a8] sm:$0xff] }
 0x7b7   : > { %vm1879_vm2 = vcmp.gt.f32.partialorder %v1662_v63, 0.0  ;;  %v1887_v18 = vmul.f32 0.01, %v1662_v63  ;;  %vm1881_vm3 = vcmp.gt.f32.partialorder %v1733_v2, 0.0  ;;  %v1889_v19 = vmul.f32 0.01, %v1733_v2 }
 0x7b8   : > { %v1888_v20 = vmul.f32 0.01, %v1664_v12  ;;  %v1890_v21 = vmul.f32 0.01, %v1735_v13  ;;  %vm1880_vm4 = vcmp.gt.f32.partialorder %v1664_v12, 0.0  ;;  %vm1882_vm5 = vcmp.gt.f32.partialorder %v1735_v13, 0.0 }
 0x7b9   : > { %v1895_v6 = vsel %vm1879_vm2, %v1662_v63, %v1887_v18  ;;  %v1897_v10 = vsel %vm1881_vm3, %v1733_v2, %v1889_v19  ;;  %v3306_v61 = vpack.c.bf16 %v1982_v55, %v1974_v50  ;;  %v1979_v63 = vld [vmem:[#allocation5 + $0x260] sm:$0xff]  ;;  %v1973_v2 = vld [vmem:[#allocation5 + $0x230] sm:$0xff]  ;;  %v3278_v53 = vpack.c.bf16 %v1996_v7, %v1988_v4 }
 0x7ba   : > { %v1896_v58 = vsel %vm1880_vm4, %v1664_v12, %v1888_v20  ;;  %v1898_v59 = vsel %vm1882_vm5, %v1735_v13, %v1890_v21  ;;  %v3276_v12 = vpack.c.bf16 %v1979_v63, %v1971_v62  ;;  %v3308_v13 = vpack.c.bf16 %v1981_v3, %v1973_v2  ;;  %v1995_v18 = vld [vmem:[#allocation5 + $0x2e0] sm:$0xff]  ;;  %v1989_v19 = vld [vmem:[#allocation5 + $0x2b0] sm:$0xff]  ;;  %v2004_v21 = vld [vmem:[#allocation5 + $0x328] sm:$0xff] }
 0x7bb   : > { %2102 = vmatprep.mubr.f32.mxu1 %v1896_v58  ;;  %2172 = vmatprep.mubr.f32.mxu0 %v1898_v59  ;;  %v1997_v20 = vld [vmem:[#allocation5 + $0x2f0] sm:$0xff]  ;;  %v2014_v58 = vld [vmem:[#allocation5 + $0x378] sm:$0xff]  ;;  %v3280_v59 = vpack.c.bf16 %v1995_v18, %v1987_v17  ;;  %v1586_v44 = vrot.slane %v4164_v48, %v1585_v35  ;;  %v2499_v3 = vld [vmem:[%s4257_s19] ss:$0 sm:$0xff] }
 0x7bc   : > { %2103 = vmatmul.mubr.f32.vlgmr.msra.gmra.mrb[12].mxu1 %v1895_v6  ;;  %2173 = vmatmul.mubr.f32.vlgmr.msra.gmra.mrb[10].mxu0 %v1897_v10  ;;  %v2003_v10 = vld [vmem:[#allocation5 + $0x320] sm:$0xff] }
 0x7bd   : > { %3261 = vmatpush1.bf16.xpose.msra.mxu1 %v3260_v22  ;;  %3293 = vmatpush1.bf16.xpose.msra.mxu0 %v3292_v23  ;;  %v2012_v22 = vld [vmem:[#allocation5 + $0x368] sm:$0xff]  ;;  %v2006_v23 = vld [vmem:[#allocation5 + $0x338] sm:$0xff]  ;;  %v3284_v27 = vpack.c.bf16 %v2011_v1, %v2003_v10  ;;  %v2500_v1 = vld [vmem:[%s4313_s26] ss:$0 sm:$0xff]  ;;  %s3459_s26 = scalar_lea.vmem %s3458_s29, 256 }
 0x7be   : > { %3263 = vmatprep.subr.bf16.mxu1 %v3262_v54  ;;  %3295 = vmatprep.subr.bf16.mxu0 %v3294_v5  ;;  %v3312_v54 = vpack.c.bf16 %v1997_v20, %v1989_v19  ;;  %v3282_v5 = vpack.c.bf16 %v2012_v22, %v2004_v21  ;;  %v3314_v6 = vpack.c.bf16 %v2014_v58, %v2006_v23  ;;  %p3461_p7 = scmp.lt.s32.totalorder %s3459_s26, %s3453_s24 }
 0x7c0   : > { %p3462_p8 = por %p3461_p7, %p3460_p4 }
 0x7c2   : > { %p3463_p11 = pnand %p3462_p8, %p3456_p3 }
 0x7c5   : > { %3265 = vmatpush1.bf16.xpose.msra.mxu1 %v3264_v28  ;;  %3297 = vmatpush1.bf16.xpose.msra.mxu0 %v3296_v29  ;;  %v3316_v28 = vpack.c.bf16 %v2013_v15, %v2005_v11  ;;  %v3286_v29 = vpack.c.bf16 %v2028_v24, %v2020_v16  ;;  %v2501_v11 = vld [vmem:[%s4314_s2] ss:$0 sm:$0xff] }
 0x7c6   : > { %3267 = vmatprep.subr.bf16.mxu1 %v3266_v30  ;;  %3299 = vmatprep.subr.bf16.mxu0 %v3298_v31  ;;  %v3318_v30 = vpack.c.bf16 %v2030_v26, %v2022_v25  ;;  %v1573_v31 = vsub.s32 4, %v4157_v45 }
 0x7c8   : > { %v1574_v39 = vrot.slane %v4164_v48, %v1573_v31 }
 0x7cd   : > { %3269 = vmatpush1.bf16.xpose.msra.mxu1 %v3268_v40  ;;  %3301 = vmatpush1.bf16.xpose.msra.mxu0 %v3300_v41  ;;  %v1582_v40 = vrot.slane %v4164_v48, %v1581_v32  ;;  %v3288_v41 = vpack.c.bf16 %v2027_v36, %v2019_v33 }
 0x7ce   : > { %3271 = vmatprep.subr.bf16.mxu1 %v3270_v42  ;;  %3303 = vmatprep.subr.bf16.mxu0 %v3302_v43  ;;  %v3320_v42 = vpack.c.bf16 %v2029_v38, %v2021_v37  ;;  %v1578_v43 = vrot.slane %v4164_v48, %v1577_v34 }
 0x7d5   : > { %3273 = vmatpush1.bf16.xpose.msra.mxu1 %v3272_v56  ;;  %3305 = vmatpush1.bf16.xpose.msra.mxu0 %v3304_v57 }
 0x7d6   : > { %3275 = vmatprep.subr.bf16.mxu1 %v3274_v60  ;;  %3307 = vmatprep.subr.bf16.mxu0 %v3306_v61 }
 0x7dd   : > { %3277 = vmatpush1.bf16.xpose.msra.mxu1 %v3276_v12  ;;  %3309 = vmatpush1.bf16.xpose.msra.mxu0 %v3308_v13 }
 0x7de   : > { %3279 = vmatprep.subr.bf16.mxu1 %v3278_v53  ;;  %3311 = vmatprep.subr.bf16.mxu0 %v3310_v14 }
 0x7e5   : > { %3281 = vmatpush1.bf16.xpose.msra.mxu1 %v3280_v59  ;;  %3313 = vmatpush1.bf16.xpose.msra.mxu0 %v3312_v54 }
 0x7e6   : > { %3283 = vmatprep.subr.bf16.mxu1 %v3282_v5  ;;  %3315 = vmatprep.subr.bf16.mxu0 %v3314_v6 }
 0x7ed   : > { %3285 = vmatpush1.bf16.xpose.msra.mxu1 %v3284_v27  ;;  %3317 = vmatpush1.bf16.xpose.msra.mxu0 %v3316_v28 }
 0x7ee   : > { %3287 = vmatprep.subr.bf16.mxu1 %v3286_v29  ;;  %3319 = vmatprep.subr.bf16.mxu0 %v3318_v30 }
 0x7f4   : > { %v1803_v46 = vpop.f32.mrb[10].mxu1  ;;  %v1874_v47 = vpop.f32.mrb[8].mxu0 }
 0x7f5   : > { %v1804_v49 = vadd.f32 %v1803_v46, %v1574_v39  ;;  %v1875_v51 = vadd.f32 %v1874_v47, %v1582_v40  ;;  %v1805_v52 = vpop.f32.mrb[11].mxu1  ;;  %v1876_v50 = vpop.f32.mrb[9].mxu0  ;;  %3289 = vmatpush1.bf16.xpose.msra.mxu1 %v3288_v41  ;;  %3321 = vmatpush1.bf16.xpose.msra.mxu0 %v3320_v42 }
 0x7f6   : > { %v1806_v45 = vadd.f32 %v1805_v52, %v1578_v43  ;;  %v1877_v55 = vadd.f32 %v1876_v50, %v1586_v44 }
 0x7f7   : > { %vm1883_vm6 = vcmp.gt.f32.partialorder %v1804_v49, 0.0  ;;  %v1891_v56 = vmul.f32 0.01, %v1804_v49  ;;  %vm1885_vm7 = vcmp.gt.f32.partialorder %v1875_v51, 0.0  ;;  %v1893_v57 = vmul.f32 0.01, %v1875_v51 }
 0x7f8   : > { %v1892_v60 = vmul.f32 0.01, %v1806_v45  ;;  %v1894_v61 = vmul.f32 0.01, %v1877_v55  ;;  %vm1884_vm8 = vcmp.gt.f32.partialorder %v1806_v45, 0.0  ;;  %vm1886_vm9 = vcmp.gt.f32.partialorder %v1877_v55, 0.0 }
 0x7f9   : > { %v1899_v63 = vsel %vm1883_vm6, %v1804_v49, %v1891_v56  ;;  %v1901_v2 = vsel %vm1885_vm7, %v1875_v51, %v1893_v57 }
 0x7fa   : > { %v1900_v62 = vsel %vm1884_vm8, %v1806_v45, %v1892_v60  ;;  %v1902_v48 = vsel %vm1886_vm9, %v1877_v55, %v1894_v61 }
 0x7fb   : > { %2242 = vmatprep.mubr.f32.mxu1 %v1900_v62  ;;  %2312 = vmatprep.mubr.f32.mxu0 %v1902_v48 }
 0x7fc   : > { %2243 = vmatmul.mubr.f32.vlgmr.msra.gmra.mrb[14].mxu1 %v1899_v63  ;;  %2313 = vmatmul.mubr.f32.vlgmr.msra.gmra.mrb[12].mxu0 %v1901_v2 }
 0x88f   : > { %v2104_v4 = vpop.f32.mrb[12].mxu1  ;;  %v2174_v7 = vpop.f32.mrb[10].mxu0 }
 0x890   : > { %v2105_v8 = vadd.f32 %v2499_v3, %v2104_v4  ;;  %v2106_v9 = vpop.f32.mrb[13].mxu1  ;;  %v2176_v12 = vpop.f32.mrb[11].mxu0 }
 0x892   : > { %v2175_v13 = vadd.f32 %v2174_v7, %v2105_v8 }
 0x8cf   : > { %v2244_v53 = vpop.f32.mrb[14].mxu1  ;;  %v2314_v14 = vpop.f32.mrb[12].mxu0 }
 0x8d0   : > { %v2245_v17 = vadd.f32 %v2244_v53, %v2175_v13  ;;  %v2246_v18 = vpop.f32.mrb[15].mxu1  ;;  %v2316_v19 = vpop.f32.mrb[13].mxu0 }
 0x8d2   : > { %v2315_v20 = vadd.f32 %v2314_v14, %v2245_v17 }
 0x8d4   : > { %v2318_v21 = vadd.f32 %v2315_v20, %v4147_v0 }
 0x8d6   : > { %2321 = vadd.xlane.f32.xlu1 %v2318_v21 }
 0x963   : > { %v2322_v22 = vpop.xlane.xlu1 %2321 }
 0x964   : > { %v2323_v23 = vmul.f32 0.0078125, %v2322_v22 }
 0x966   : > { %v2324_v58 = vsub.f32 %v2318_v21, %v2323_v23 }
 0x968   : > { %v2325_v59 = vmul.f32 %v2324_v58, %v2324_v58 }
 0x96a   : > { %2326 = vadd.xlane.f32.xlu0 %v2325_v59 }
 0x9f7   : > { %v2327_v54 = vpop.xlane.xlu0 %2326 }
 0x9f8   : > { %v2328_v5 = vmul.f32 0.0078125, %v2327_v54 }
 0x9fa   : > { %v2329_v6 = vadd.f32 1e-05, %v2328_v5 }
 0x9fc   : > { %3395 = vrsqrt.f32 %v2329_v6 }
 0xa06   : > { %v3396_v10 = vpop.eup %3395 }
 0xa07   : > { %v2331_v0 = vmul.f32 %v3396_v10, %v2324_v58 }
 0xa09   : > { %v2338_v15 = vmul.f32 %v2500_v1, %v2331_v0 }
 0xa0b   : > { %v2345_v16 = vadd.f32 %v2501_v11, %v2338_v15 }
 0xa0d   : > { %2346 = vst [vmem:[%s743_s27] sm:$0xff] %v2345_v16 }
 0xa0e   : > { %3466 = shalt.err (!%p3463_p11)
}
 0xa0f   : > { %s3467_s22 = scalar_lea.hbm %s4196_s21, 128  ;;  %s3471_s2 = scalar_lea.hbm %s4315_s20, 256 }
 0xa10   : > { %p3468_p13 = scmp.ne.s32.totalorder %s4196_s21, %s3467_s22  ;;  %p3472_p6 = scmp.lt.u32.totalorder %s4196_s21, %s4315_s20 }
 0xa11   : > { %p3473_p9 = scmp.lt.u32.totalorder %s3471_s2, %s3467_s22  ;;  %p3475_p10 = scmp.lt.u32.totalorder %s3467_s22, %s4196_s21 }
 0xa12   : > { %p3469_p0 = pnand %p3468_p13, %p4316_p1 }
 0xa13   : > { %p3474_p12 = por %p3473_p9, %p3472_p6 }
 0xa14   : > { %p3470_p5 = pneg %p3469_p0 }
 0xa15   : > { %p3476_p2 = por %p3475_p10, %p3474_p12 }
 0xa17   : > { %p3477_p3 = pnand %p3476_p2, %p3470_p5 }
 0xa19   : > { %3480 = shalt.err (!%p3477_p3)
}
 0xa1a   : > { %3330 = dma.vmem_to_hbm [thread:$0]  (%p4316_p1), %s4198_s16, 128, %s4196_s21, %s2348_s5  }
 0xa1b PF: > { %s4317_s30 = sld [smem:[#allocation13_spill]]  ;;  %s4318_s8 = sld [smem:[#allocation11_spill]] }
 0xa1c   : > { %s4319_s24 = sld [smem:[#allocation16_spill]] }
 0xa21   : > { %p3347_p4 = scmp.ge.s32.totalorder %s4317_s30, 2  ;;  %s2373_s4 = sand.u32 1, %s4318_s8  }
 0xa22   : > { %p4320_p7 = scmp.ne.s32.totalorder %s4319_s24, 0  ;;  %s2374_s29 = scalar_lea.sflag [#allocation4], %s2373_s4 }
 0xa24   : > { %p3340_p8 = pnand %p3347_p4, %p4320_p7 }
 0xa26   : > { %3506 = dma.done.wait (!%p3340_p8), %s2374_s29, 128  }
 0xa27   : > { %3508 = vsyncadd (!%p3340_p8), %s2374_s29, 4294967168  ;;  %s4321_s30 = sld [smem:[#allocation14_spill]]  ;;  %s4322_s26 = sld [smem:[#allocation12_spill]] }
 0xa28   : > { %s4323_s29 = sld [smem:[#allocation15_spill]]  ;;  %s4324_s3 = smov %s3515_s28 }
 0xa2d   : > { %p34_p11 = scmp.ge.s32.totalorder %s4321_s30, 4   ;;  %s4325_s28 = smov %s4322_s26 }
 0xa2f   :  { %36 = sbr.rel (!%p34_p11) target bundleno = 19 (0x13), region = 161 }
 0xa36   :  { %2379 = vsyncpa [#allocation3], 1 }
 0xa37   :  { %2381 = vsyncpa [#allocation3 + $0x1], 1 }
 0xa38   :  { %2382 = vsyncpa [#allocation6], 1 }
 0xa39   :  { %2383 = vsyncpa [#allocation4], 1 }
 0xa3a   :  { %2385 = vsyncpa [#allocation4 + $0x1], 1 }

</bundles_post_ra>
